<compile_context>
chip_gen: v7x
topology: tpu7x:2x2x1
jax: 0.10.0
libtpu: 0.0.40
codegen_flags: <defaults>
</compile_context>

<pallas_src>
import functools

import jax
import jax.numpy as jnp
import numpy as np
from jax.experimental import pallas as pl
from jax.experimental.pallas import tpu as pltpu


def _node_features_kernel(x_ref, uw_ref, vw_ref, eg_ref, o_ref, *, aggregation):
    # Per grid step (b, i):
    #   x_ref  : (H+1, N)        full node features for batch b (+ ones row for bias)
    #   uw_ref : (tile_h, H+1)   U weight rows for this channel tile (+ bias column)
    #   vw_ref : (tile_h, H+1)   V weight rows for this channel tile (+ bias column)
    #   eg_ref : (tile_h, N, N)  edge gates for this channel tile
    #   o_ref  : (tile_h, N)
    x = x_ref[...]

    # 1x1 Conv1d == channel-mix matmul on the MXU; bias folded in via the augmentation.
    ux = jnp.dot(uw_ref[...], x, preferred_element_type=jnp.float32)   # (tile_h, N)
    vx = jnp.dot(vw_ref[...], x, preferred_element_type=jnp.float32)   # (tile_h, N)

    # sum_m(gate[h,n,m] * Vx[h,n]) == Vx[h,n] * sum_m(gate[h,n,m]):
    # only stream-reduce edge_gate, never build the (H, N, N) product.
    # (astype keeps the reduction in f32 even if edge_gate is streamed as bf16.)
    s = jnp.sum(eg_ref[...].astype(jnp.float32), axis=-1)              # (tile_h, N)

    if aggregation == "mean":
        d = 1e-20 + s
        inv = pl.reciprocal(d, approx=True)        # EUP slot — free under the DMA stream
        inv = inv * (2.0 - d * inv)                # two Newton steps -> full f32 accuracy
        inv = inv * (2.0 - d * inv)
        agg = vx * (s * inv)
    else:  # 'sum'
        agg = vx * s

    o_ref[...] = (ux + agg).astype(o_ref.dtype)


def node_features(x, edge_gate, u_w, u_b, v_w, v_b, aggregation="mean", tile_h=None):
    """x: (B, H, N), edge_gate: (B, H, N, N), u_w/v_w: (H, H), u_b/v_b: (H,)."""
    if aggregation not in ("mean", "sum"):
        raise ValueError(f"unknown aggregation: {aggregation}")
    B, H, N = x.shape
    assert edge_gate.shape == (B, H, N, N)

    # Fold the conv biases into the matmul: ones-row on x, bias-column on the weights.
    x_aug = jnp.concatenate([x, jnp.ones((B, 1, N), x.dtype)], axis=1)       # (B, H+1, N)
    uw_aug = jnp.concatenate([u_w, u_b[:, None]], axis=1)                    # (H, H+1)
    vw_aug = jnp.concatenate([v_w, v_b[:, None]], axis=1)                    # (H, H+1)

    # Channel tiling: each edge_gate block is tile_h * N * N * itemsize bytes.
    # Target ~4 MiB per block so 2x double-buffering + x/weights/out stays well under
    # the smallest per-generation scoped-VMEM budgets (v5e 16 MiB default, v7x 64 MiB).
    if tile_h is None:
        target_bytes = 4 * 1024 * 1024
        per_channel = N * N * edge_gate.dtype.itemsize
        cap = (target_bytes // per_channel) // 8 * 8
        tile_h = H if cap >= H else max(8, cap)
    tile_h = min(tile_h, H)
    grid = (B, pl.cdiv(H, tile_h))

    kernel = functools.partial(_node_features_kernel, aggregation=aggregation)

    return pl.pallas_call(
        kernel,
        out_shape=jax.ShapeDtypeStruct((B, H, N), x.dtype),
        grid_spec=pltpu.PrefetchScalarGridSpec(
            num_scalar_prefetch=0,
            grid=grid,
            in_specs=[
                # x_aug[b] — index map constant in i, so it is DMA'd once per batch.
                pl.BlockSpec((None, H + 1, N), lambda b, i: (b, 0, 0)),
                pl.BlockSpec((tile_h, H + 1), lambda b, i: (i, 0)),          # U rows tile
                pl.BlockSpec((tile_h, H + 1), lambda b, i: (i, 0)),          # V rows tile
                pl.BlockSpec((None, tile_h, N, N), lambda b, i: (b, i, 0, 0)),  # edge_gate
            ],
            out_specs=pl.BlockSpec((None, tile_h, N), lambda b, i: (b, i, 0)),
        ),
        compiler_params=pltpu.CompilerParams(
            dimension_semantics=("parallel", "parallel"),
            vmem_limit_bytes=32 * 1024 * 1024,
        ),
    )(x_aug, uw_aug, vw_aug, edge_gate)


def node_features_reference(x, edge_gate, u_w, u_b, v_w, v_b, aggregation="mean"):
    """Plain-JAX mirror of the PyTorch forward (no algebraic simplification)."""
    ux = jnp.einsum("oc,bcn->bon", u_w, x) + u_b[None, :, None]
    vx = jnp.einsum("oc,bcn->bon", v_w, x) + v_b[None, :, None]
    gate_vx = edge_gate * vx[:, :, :, None]
    if aggregation == "mean":
        return ux + jnp.sum(gate_vx, axis=3) / (1e-20 + jnp.sum(edge_gate, axis=3))
    return ux + jnp.sum(gate_vx, axis=3)


if __name__ == "__main__":
    B, H, N = 2, 64, 32  # batch, hidden_dim, num_nodes

    key = jax.random.PRNGKey(0)
    kx, ke, kuw, kub, kvw, kvb = jax.random.split(key, 6)

    x = jax.random.normal(kx, (B, H, N), dtype=jnp.float32)
    # edge gates in [0, 1) like sigmoid outputs
    edge_gate = jax.random.uniform(ke, (B, H, N, N), dtype=jnp.float32)

    # Deterministic Conv1d(H, H, 1) parameters (weight squeezed to (H, H)).
    bound = 1.0 / np.sqrt(H)
    u_w = jax.random.uniform(kuw, (H, H), jnp.float32, -bound, bound)
    u_b = jax.random.uniform(kub, (H,), jnp.float32, -bound, bound)
    v_w = jax.random.uniform(kvw, (H, H), jnp.float32, -bound, bound)
    v_b = jax.random.uniform(kvb, (H,), jnp.float32, -bound, bound)

    for agg in ("mean", "sum"):
        # tile_h=16 exercises the (batch x channel-tile) grid: grid = (2, 4).
        out = node_features(x, edge_gate, u_w, u_b, v_w, v_b, aggregation=agg, tile_h=16)
        out = jax.block_until_ready(out)
        ref = node_features_reference(x, edge_gate, u_w, u_b, v_w, v_b, aggregation=agg)
        np.testing.assert_allclose(np.asarray(out), np.asarray(ref), rtol=1e-5, atol=1e-5)

    print("KERNEL_OK")
</pallas_src>

<mosaic_0001>
module attributes {stable_mosaic.version = 11 : i64} {
  func.func @_node_features_kernel(%arg0: i32, %arg1: i32, %arg2: memref<1x65x32xf32, #tpu.memory_space<vmem>>, %arg3: memref<16x65xf32, #tpu.memory_space<vmem>>, %arg4: memref<16x65xf32, #tpu.memory_space<vmem>>, %arg5: memref<1x16x32x32xf32, #tpu.memory_space<vmem>>, %arg6: memref<1x16x32xf32, #tpu.memory_space<vmem>>) attributes {dimension_semantics = [#tpu.dimension_semantics<parallel>, #tpu.dimension_semantics<parallel>], iteration_bounds = array<i64: 2, 4>, scalar_prefetch = 0 : i64, scratch_operands = 0 : i64, tpu.core_type = #tpu.core_type<tc>, window_params = [{transform_indices = @transform_0, window_bounds = array<i64: 1, 65, 32>}, {transform_indices = @transform_1, window_bounds = array<i64: 16, 65>}, {transform_indices = @transform_2, window_bounds = array<i64: 16, 65>}, {transform_indices = @transform_3, window_bounds = array<i64: 1, 16, 32, 32>}, {transform_indices = @transform_4, window_bounds = array<i64: 1, 16, 32>}]} {
    %c0 = arith.constant 0 : index
    %c0_0 = arith.constant 0 : index
    %c0_1 = arith.constant 0 : index
    %0 = vector.load %arg2[%c0, %c0_0, %c0_1] : memref<1x65x32xf32, #tpu.memory_space<vmem>>, vector<1x65x32xf32>
    %1 = vector.shape_cast %0 : vector<1x65x32xf32> to vector<65x32xf32>
    %c0_2 = arith.constant 0 : index
    %c0_3 = arith.constant 0 : index
    %2 = vector.load %arg3[%c0_2, %c0_3] : memref<16x65xf32, #tpu.memory_space<vmem>>, vector<16x65xf32>
    %cst = arith.constant dense<0.000000e+00> : vector<16x32xf32>
    %3 = tpu.matmul %2, %1, %cst {dimension_numbers = #tpu.dot_dimension_numbers<[1], [0], [0], [1], [0, 0, 1, 1], [], []>} : vector<16x65xf32>, vector<65x32xf32>, vector<16x32xf32> -> vector<16x32xf32>
    %c0_4 = arith.constant 0 : index
    %c0_5 = arith.constant 0 : index
    %4 = vector.load %arg4[%c0_4, %c0_5] : memref<16x65xf32, #tpu.memory_space<vmem>>, vector<16x65xf32>
    %cst_6 = arith.constant dense<0.000000e+00> : vector<16x32xf32>
    %5 = tpu.matmul %4, %1, %cst_6 {dimension_numbers = #tpu.dot_dimension_numbers<[1], [0], [0], [1], [0, 0, 1, 1], [], []>} : vector<16x65xf32>, vector<65x32xf32>, vector<16x32xf32> -> vector<16x32xf32>
    %c0_7 = arith.constant 0 : index
    %c0_8 = arith.constant 0 : index
    %c0_9 = arith.constant 0 : index
    %c0_10 = arith.constant 0 : index
    %6 = vector.load %arg5[%c0_7, %c0_8, %c0_9, %c0_10] : memref<1x16x32x32xf32, #tpu.memory_space<vmem>>, vector<1x16x32x32xf32>
    %7 = vector.shape_cast %6 : vector<1x16x32x32xf32> to vector<16x32x32xf32>
    %cst_11 = arith.constant dense<0.000000e+00> : vector<16x32xf32>
    %8 = vector.multi_reduction <add>, %7, %cst_11 [2] : vector<16x32x32xf32> to vector<16x32xf32>
    %cst_12 = arith.constant 9.99999968E-21 : f32
    %9 = vector.broadcast %cst_12 : f32 to vector<16x32xf32>
    %10 = arith.addf %9, %8 : vector<16x32xf32>
    %11 = tpu.reciprocal %10 {approx = true} : vector<16x32xf32> -> vector<16x32xf32>
    %12 = arith.mulf %10, %11 : vector<16x32xf32>
    %cst_13 = arith.constant 2.000000e+00 : f32
    %13 = vector.broadcast %cst_13 : f32 to vector<16x32xf32>
    %14 = arith.subf %13, %12 : vector<16x32xf32>
    %15 = arith.mulf %11, %14 : vector<16x32xf32>
    %16 = arith.mulf %10, %15 : vector<16x32xf32>
    %cst_14 = arith.constant 2.000000e+00 : f32
    %17 = vector.broadcast %cst_14 : f32 to vector<16x32xf32>
    %18 = arith.subf %17, %16 : vector<16x32xf32>
    %19 = arith.mulf %15, %18 : vector<16x32xf32>
    %20 = arith.mulf %8, %19 : vector<16x32xf32>
    %21 = arith.mulf %5, %20 : vector<16x32xf32>
    %22 = arith.addf %3, %21 : vector<16x32xf32>
    %c0_15 = arith.constant 0 : index
    %c0_16 = arith.constant 0 : index
    %c0_17 = arith.constant 0 : index
    %23 = vector.load %arg6[%c0_15, %c0_16, %c0_17] : memref<1x16x32xf32, #tpu.memory_space<vmem>>, vector<1x16x32xf32>
    %24 = vector.shape_cast %23 : vector<1x16x32xf32> to vector<16x32xf32>
    %25 = vector.shape_cast %22 : vector<16x32xf32> to vector<1x16x32xf32>
    tpu.vector_store %arg6[%c0_15, %c0_16, %c0_17], %25 {strides = array<i32>} : memref<1x16x32xf32, #tpu.memory_space<vmem>>, vector<1x16x32xf32>,
    return
  }
  func.func @transform_0(%arg0: i32, %arg1: i32) -> (i32, i32, i32) {
    %c0_i32 = arith.constant 0 : i32
    %c0_i32_0 = arith.constant 0 : i32
    %c0_i32_1 = arith.constant 0 : i32
    return %arg0, %c0_i32, %c0_i32_0 : i32, i32, i32
  }
  func.func @transform_1(%arg0: i32, %arg1: i32) -> (i32, i32) {
    %c0_i32 = arith.constant 0 : i32
    %c0_i32_0 = arith.constant 0 : i32
    return %arg1, %c0_i32 : i32, i32
  }
  func.func @transform_2(%arg0: i32, %arg1: i32) -> (i32, i32) {
    %c0_i32 = arith.constant 0 : i32
    %c0_i32_0 = arith.constant 0 : i32
    return %arg1, %c0_i32 : i32, i32
  }
  func.func @transform_3(%arg0: i32, %arg1: i32) -> (i32, i32, i32, i32) {
    %c0_i32 = arith.constant 0 : i32
    %c0_i32_0 = arith.constant 0 : i32
    %c0_i32_1 = arith.constant 0 : i32
    return %arg0, %arg1, %c0_i32, %c0_i32_0 : i32, i32, i32, i32
  }
  func.func @transform_4(%arg0: i32, %arg1: i32) -> (i32, i32, i32) {
    %c0_i32 = arith.constant 0 : i32
    %c0_i32_0 = arith.constant 0 : i32
    return %arg0, %arg1, %c0_i32 : i32, i32, i32
  }
}

</mosaic_0001>

<bundles_post_ra>
// kernel: tpu_custom_call.1
= control target key start
LH: loop header
LB: loop body
LE: loop exit
PB: predicated region body
PF: predicated region fallthrough
CT: control target
= control target key end

     0   :  { %s2204_s15 = smov 0   ;;  %s2206_s16 = smov 0   ;;  %s3312_s0 = inlined_call_operand.vmem [shape: f32[2,65,32], index: 0, kind: input, shape index: {}]   ;;  %s3313_s1 = inlined_call_operand.vmem [shape: f32[64,65], index: 1, kind: input, shape index: {}]   ;;  %s3314_s2 = inlined_call_operand.vmem [shape: f32[64,65], index: 2, kind: input, shape index: {}]   ;;  %s3315_s3 = inlined_call_operand.vmem [shape: f32[2,64,32,32], index: 3, kind: input, shape index: {}]   ;;  %s3316_s4 = inlined_call_operand.vmem [shape: f32[2,64,32], index: 4, kind: output, shape index: {}]  }
   0x1   :  { %s2208_s17 = smov 0   ;;  %s2210_s18 = smov 0  }
   0x2   :  { %s2212_s19 = smov 0  }
   0x3 LB: > { %s23_s20 = sadd.s32 1, %s2169_s17  ;;  %s26_s21 = sadd.s32 1, %s2173_s18  ;;  %s2177_s19 = sphi %s2212_s19, %s14_s19   ;;  %s2173_s18 = sphi %s2210_s18, %s3404_s18   ;;  %s2169_s17 = sphi %s2208_s17, %s3403_s17   ;;  %s2165_s16 = sphi %s2206_s16, %s3402_s16   ;;  %s2161_s15 = sphi %s2204_s15, %s3401_s15  }
   0x4   : > { %p24_p0 = scmp.ge.s32.totalorder %s23_s20, 4  ;;  %p1853_p1 = scmp.ge.s32.totalorder %s2177_s19, 1 }
   0x5   : > { %p216_p2 = scmp.lt.s32.totalorder %s2177_s19, 9 }
   0x6   : > { %s3406_s20 = smov (%p24_p0, %s23_s20), 0  ;;  %s3408_s21 = smov (!%p24_p0, %s26_s21), %s2173_s18 }
   0x7   : > { %p217_p3 = pnand %p1853_p1, %p216_p2  ;;  %p28_p4 = scmp.ge.s32.totalorder %s3408_s21, 2 }
   0x9   : > { %s3410_s21 = smov (%p28_p4, %s3408_s21), 0  ;;  %220 = sbr.rel (%p217_p3) target bundleno = 370 (0x172), region = 36 }
  0x10   : > { %p266_p5 = scmp.lt.s32.totalorder %s2165_s16, 1  ;;  %s1859_s22 = sshll.u32 %s2161_s15, 4  ;;  %vm467_vm0 = vcmask 261120   ;;  %vm324_vm1 = vcmask 1040384   ;;  %vm317_vm2 = vcmask 531456   ;;  %vm1311_vm3 = vcmask 130112  }
  0x11   : > { %p286_p6 = scmp.lt.s32.totalorder %s1859_s22, 63  ;;  %s1855_s23 = sshll.u32 %s2161_s15, 1  ;;  %vm1318_vm4 = vcmask 195712   ;;  %vm1325_vm5 = vcmask 261312   ;;  %vm1612_vm6 = vcmask 1041409   ;;  %vm1614_vm7 = vcmask 1042434  }
  0x12   : > { %s3412_s16 = smov (!%p266_p5, %s2165_s16), 1  ;;  %p2242_p7 = scmp.lt.s32.totalorder %s1855_s23, 7  ;;  %vm1616_vm8 = vcmask 1043459   ;;  %vm1618_vm9 = vcmask 1044484   ;;  %vm1620_vm10 = vcmask 1045509   ;;  %vm1622_vm11 = vcmask 1046534  }
  0x13   : > { %s3414_s22 = smov (!%p286_p6, %s1859_s22), 63  ;;  %s1861_s24 = sshll.u32 %s3412_s16, 8  ;;  %vm1624_vm12 = vcmask 1047559  }
  0x14   : > { %s1970_s25 = smul.u32 72, %s3412_s16  ;;  %s1860_s26 = sshll.u32 %s3414_s22, 2 }
  0x15   : > { %s290_s28 = sadd.s32 %s1861_s24, %s1860_s26  ;;  %s1864_s10 = sshll.u32 %s3412_s16, 3 }
  0x16   : > { %s2249_s5 = scalar_lea.vmem %s3312_s0, %s1970_s25  ;;  %s1862_s6 = sshll.u32 %s290_s28, 3 }
  0x17   : > { %v304_v0 = vld [vmem:[%s2249_s5] sm:$0xff]  ;;  %v305_v1 = vld [vmem:[%s2249_s5 + $0x8] sm:$0xff]  ;;  %v306_v2 = vld [vmem:[%s2249_s5 + $0x10] sm:$0xff]  ;;  %s2257_s9 = scalar_lea.vmem %s3315_s3, %s1862_s6  ;;  %s3416_s23 = smov (!%p2242_p7, %s1855_s23), 7 }
  0x18   : > { %v1938_v3 = vpack.c.bf16 %v305_v1, %v304_v0  ;;  %v307_v4 = vld [vmem:[%s2249_s5 + $0x18] sm:$0xff]  ;;  %v405_v5 = vld [vmem:[%s2257_s9 + $0x10] sm:$0xff]  ;;  %v403_v6 = vld [vmem:[%s2257_s9] sm:$0xff]  ;;  %s2274_s11 = sadd.s32 %s1864_s10, %s3416_s23  ;;  %s1856_s12 = sshll.u32 %s3416_s23, 3 }
  0x19   : > { %v406_v7 = vld [vmem:[%s2257_s9 + $0x18] sm:$0xff]  ;;  %v1942_v8 = vpack.c.bf16 %v307_v4, %v306_v2  ;;  %v474_v9 = vsel %vm467_vm0, %v405_v5, 0.0  ;;  %v468_v10 = vsel %vm467_vm0, %v403_v6, 0.0  ;;  %v404_v11 = vld [vmem:[%s2257_s9 + $0x8] sm:$0xff]  ;;  %v308_v12 = vld [vmem:[%s2249_s5 + $0x20] sm:$0xff]  ;;  %s281_s15 = scalar_lea.vmem %s3314_s2, %s1856_s12  ;;  %s275_s23 = scalar_lea.vmem %s3313_s1, %s1856_s12 }
  0x1a   : > { %1939 = vmatprep.subr.bf16.mxu0 %v1938_v3  ;;  %1955 = vmatprep.subr.bf16.mxu1 %v1938_v3  ;;  %v309_v13 = vld [vmem:[%s2249_s5 + $0x28] sm:$0xff]  ;;  %v477_v14 = vsel %vm467_vm0, %v406_v7, 0.0  ;;  %v471_v15 = vsel %vm467_vm0, %v404_v11, 0.0  ;;  %v407_v17 = vld [vmem:[%s2257_s9 + $0x20] sm:$0xff]  ;;  %v409_v22 = vld [vmem:[%s2257_s9 + $0x30] sm:$0xff]  ;;  %s1865_s24 = sshll.u32 %s2274_s11, 3 }
  0x1b   : > { %475 = vadd.xlane.f32.xlu1 %v474_v9  ;;  %469 = vadd.xlane.f32.xlu0 %v468_v10  ;;  %v408_v16 = vld [vmem:[%s2257_s9 + $0x28] sm:$0xff]  ;;  %v1946_v18 = vpack.c.bf16 %v309_v13, %v308_v12  ;;  %v480_v20 = vsel %vm467_vm0, %v407_v17, 0.0  ;;  %v435_v21 = vld [vmem:[%s2257_s9 + $0x100] sm:$0xff]  ;;  %v486_v24 = vsel %vm467_vm0, %v409_v22, 0.0  ;;  %v310_v27 = vld [vmem:[%s2249_s5 + $0x30] sm:$0xff]  ;;  %s302_s27 = scalar_lea.vmem %s3316_s4, %s1865_s24 }
  0x1c   : > { %1941 = vmatpush3.bf16.msra.mxu0 %v1938_v3  ;;  %1957 = vmatpush3.bf16.msra.mxu1 %v1938_v3  ;;  %v483_v19 = vsel %vm467_vm0, %v408_v16, 0.0  ;;  %v564_v23 = vsel %vm467_vm0, %v435_v21, 0.0  ;;  %v439_v25 = vld [vmem:[%s2257_s9 + $0x120] sm:$0xff]  ;;  %v436_v26 = vld [vmem:[%s2257_s9 + $0x108] sm:$0xff]  ;;  %v311_v28 = vld [vmem:[%s2249_s5 + $0x38] sm:$0xff] }
  0x1d   : > { %1943 = vmatprep.subr.bf16.mxu0 %v1942_v8  ;;  %1959 = vmatprep.subr.bf16.mxu1 %v1942_v8  ;;  %v1950_v29 = vpack.c.bf16 %v311_v28, %v310_v27  ;;  %v576_v30 = vsel %vm467_vm0, %v439_v25, 0.0  ;;  %v567_v31 = vsel %vm467_vm0, %v436_v26, 0.0  ;;  %v411_v32 = vld [vmem:[%s2257_s9 + $0x40] sm:$0xff]  ;;  %v440_v33 = vld [vmem:[%s2257_s9 + $0x128] sm:$0xff]  ;;  %v437_v39 = vld [vmem:[%s2257_s9 + $0x110] sm:$0xff] }
  0x1e   : > { %v312_v34 = vld [vmem:[%s2249_s5 + $0x40] sm:$0x1]  ;;  %v492_v37 = vsel %vm467_vm0, %v411_v32, 0.0  ;;  %v579_v38 = vsel %vm467_vm0, %v440_v33, 0.0  ;;  %v412_v40 = vld [vmem:[%s2257_s9 + $0x48] sm:$0xff]  ;;  %v570_v43 = vsel %vm467_vm0, %v437_v39, 0.0 }
  0x1f   : > { %478 = vadd.xlane.f32.xlu1 %v477_v14  ;;  %472 = vadd.xlane.f32.xlu0 %v471_v15  ;;  %v315_v35 = vld [vmem:[%s281_s15] sm:$0xff]  ;;  %v316_v41 = vld [vmem:[%s281_s15 + $0x8] sm:$0xff]  ;;  %v495_v44 = vsel %vm467_vm0, %v412_v40, 0.0  ;;  %v441_v46 = vld [vmem:[%s2257_s9 + $0x130] sm:$0xff] }
  0x20   : > { %1945 = vmatpush3.bf16.msra.mxu0 %v1942_v8  ;;  %1961 = vmatpush3.bf16.msra.mxu1 %v1942_v8  ;;  %v313_v36 = vld [vmem:[%s275_s23] sm:$0xff]  ;;  %v314_v42 = vld [vmem:[%s275_s23 + $0x8] sm:$0xff]  ;;  %v582_v48 = vsel %vm467_vm0, %v441_v46, 0.0  ;;  %v410_v49 = vld [vmem:[%s2257_s9 + $0x38] sm:$0xff] }
  0x21   : > { %1947 = vmatprep.subr.bf16.mxu0 %v1946_v18  ;;  %1963 = vmatprep.subr.bf16.mxu1 %v1946_v18  ;;  %v443_v45 = vld [vmem:[%s2257_s9 + $0x140] sm:$0xff]  ;;  %v444_v50 = vld [vmem:[%s2257_s9 + $0x148] sm:$0xff]  ;;  %v489_v51 = vsel %vm467_vm0, %v410_v49, 0.0  ;;  %v413_v54 = vld [vmem:[%s2257_s9 + $0x50] sm:$0xff] }
  0x22   : > { %1914 = vmatprep.mubr.msk.f32.mxu0 %vm317_vm2, %v315_v35  ;;  %1935 = vmatprep.mubr.msk.f32.mxu1 %vm317_vm2, %v313_v36  ;;  %v588_v47 = vsel %vm467_vm0, %v443_v45, 0.0  ;;  %v591_v52 = vsel %vm467_vm0, %v444_v50, 0.0  ;;  %v415_v53 = vld [vmem:[%s2257_s9 + $0x60] sm:$0xff]  ;;  %v498_v56 = vsel %vm467_vm0, %v413_v54, 0.0  ;;  %v438_v57 = vld [vmem:[%s2257_s9 + $0x118] sm:$0xff]  ;;  %v416_v58 = vld [vmem:[%s2257_s9 + $0x68] sm:$0xff] }
  0x23   : > { %484 = vadd.xlane.f32.xlu1 %v483_v19  ;;  %481 = vadd.xlane.f32.xlu0 %v480_v20  ;;  %v504_v55 = vsel %vm467_vm0, %v415_v53, 0.0  ;;  %v573_v59 = vsel %vm467_vm0, %v438_v57, 0.0  ;;  %v507_v60 = vsel %vm467_vm0, %v416_v58, 0.0  ;;  %v445_v61 = vld [vmem:[%s2257_s9 + $0x150] sm:$0xff]  ;;  %v442_v62 = vld [vmem:[%s2257_s9 + $0x138] sm:$0xff]  ;;  %v448_v1 = vld [vmem:[%s2257_s9 + $0x168] sm:$0xff] }
  0x24   : > { %1949 = vmatpush3.bf16.msra.mxu0 %v1946_v18  ;;  %1965 = vmatpush3.bf16.msra.mxu1 %v1946_v18  ;;  %v594_v63 = vsel %vm467_vm0, %v445_v61, 0.0  ;;  %v585_v0 = vsel %vm467_vm0, %v442_v62, 0.0  ;;  %v447_v2 = vld [vmem:[%s2257_s9 + $0x160] sm:$0xff]  ;;  %v603_v3 = vsel %vm467_vm0, %v448_v1, 0.0  ;;  %v417_v5 = vld [vmem:[%s2257_s9 + $0x70] sm:$0xff]  ;;  %v414_v6 = vld [vmem:[%s2257_s9 + $0x58] sm:$0xff] }
  0x25   : > { %1951 = vmatprep.subr.bf16.mxu0 %v1950_v29  ;;  %1967 = vmatprep.subr.bf16.mxu1 %v1950_v29  ;;  %v600_v4 = vsel %vm467_vm0, %v447_v2, 0.0  ;;  %v510_v7 = vsel %vm467_vm0, %v417_v5, 0.0  ;;  %v501_v8 = vsel %vm467_vm0, %v414_v6, 0.0  ;;  %v420_v9 = vld [vmem:[%s2257_s9 + $0x88] sm:$0xff]  ;;  %v419_v10 = vld [vmem:[%s2257_s9 + $0x80] sm:$0xff]  ;;  %v449_v13 = vld [vmem:[%s2257_s9 + $0x170] sm:$0xff] }
  0x26   : > { %v519_v11 = vsel %vm467_vm0, %v420_v9, 0.0  ;;  %v516_v12 = vsel %vm467_vm0, %v419_v10, 0.0  ;;  %v446_v14 = vld [vmem:[%s2257_s9 + $0x158] sm:$0xff]  ;;  %v606_v15 = vsel %vm467_vm0, %v449_v13, 0.0  ;;  %v452_v17 = vld [vmem:[%s2257_s9 + $0x188] sm:$0xff]  ;;  %v451_v18 = vld [vmem:[%s2257_s9 + $0x180] sm:$0xff] }
  0x27   : > { %565 = vadd.xlane.f32.xlu1 %v564_v23  ;;  %487 = vadd.xlane.f32.xlu0 %v486_v24  ;;  %v597_v16 = vsel %vm467_vm0, %v446_v14, 0.0  ;;  %v615_v19 = vsel %vm467_vm0, %v452_v17, 0.0  ;;  %v612_v20 = vsel %vm467_vm0, %v451_v18, 0.0  ;;  %v421_v21 = vld [vmem:[%s2257_s9 + $0x90] sm:$0xff]  ;;  %v418_v22 = vld [vmem:[%s2257_s9 + $0x78] sm:$0xff]  ;;  %v424_v25 = vld [vmem:[%s2257_s9 + $0xa8] sm:$0xff] }
  0x28   : > { %1953 = vmatpush3.bf16.msra.mxu0 %v1950_v29  ;;  %1969 = vmatpush3.bf16.msra.mxu1 %v1950_v29  ;;  %v522_v23 = vsel %vm467_vm0, %v421_v21, 0.0  ;;  %v513_v24 = vsel %vm467_vm0, %v418_v22, 0.0  ;;  %v423_v26 = vld [vmem:[%s2257_s9 + $0xa0] sm:$0xff]  ;;  %v531_v27 = vsel %vm467_vm0, %v424_v25, 0.0  ;;  %v453_v29 = vld [vmem:[%s2257_s9 + $0x190] sm:$0xff]  ;;  %v456_v33 = vld [vmem:[%s2257_s9 + $0x1a8] sm:$0xff]  ;;  %v1300_v25 = vlaneseq }
  0x29   : > { %1912 = vmatprep.subr.msk.mxu0 %vm324_vm1, %v312_v34  ;;  %1933 = vmatprep.subr.msk.mxu1 %vm324_vm1, %v312_v34  ;;  %v528_v28 = vsel %vm467_vm0, %v423_v26, 0.0  ;;  %v627_v35 = vsel %vm467_vm0, %v456_v33, 0.0  ;;  %v457_v45 = vld [vmem:[%s2257_s9 + $0x1b0] sm:$0xff]  ;;  %v454_v46 = vld [vmem:[%s2257_s9 + $0x198] sm:$0xff]  ;;  %v460_v49 = vld [vmem:[%s2257_s9 + $0x1c8] sm:$0xff] }
  0x2a   : > { %v459_v50 = vld [vmem:[%s2257_s9 + $0x1c0] sm:$0xff]  ;;  %v429_v53 = vld [vmem:[%s2257_s9 + $0xd0] sm:$0xff]  ;;  %v426_v54 = vld [vmem:[%s2257_s9 + $0xb8] sm:$0xff] }
  0x2b   : > { %577 = vadd.xlane.f32.xlu1 %v576_v30  ;;  %568 = vadd.xlane.f32.xlu0 %v567_v31  ;;  %v450_v30 = vld [vmem:[%s2257_s9 + $0x178] sm:$0xff]  ;;  %v618_v31 = vsel %vm467_vm0, %v453_v29, 0.0  ;;  %v432_v57 = vld [vmem:[%s2257_s9 + $0xe8] sm:$0xff]  ;;  %v431_v58 = vld [vmem:[%s2257_s9 + $0xe0] sm:$0xff] }
  0x2c   : > { %1913 = vmatpush3.msk.msra.mxu0 %vm324_vm1, %v312_v34  ;;  %1934 = vmatpush3.msk.msra.mxu1 %vm324_vm1, %v312_v34  ;;  %v609_v32 = vsel %vm467_vm0, %v450_v30, 0.0  ;;  %v455_v34 = vld [vmem:[%s2257_s9 + $0x1a0] sm:$0xff]  ;;  %v461_v61 = vld [vmem:[%s2257_s9 + $0x1d0] sm:$0xff]  ;;  %v458_v62 = vld [vmem:[%s2257_s9 + $0x1b8] sm:$0xff]  ;;  %v1301_v30 = vand.u32 127, %v1300_v25 }
  0x2d   : > { %1915 = vmatmul.mubr.msk.f32.vlgmr.msra.gmra.mrb[0].mxu0 %vm317_vm2, %v316_v41  ;;  %1936 = vmatmul.mubr.msk.f32.vlgmr.msra.gmra.mrb[0].mxu1 %vm317_vm2, %v314_v42  ;;  %v624_v36 = vsel %vm467_vm0, %v455_v34, 0.0  ;;  %v428_v41 = vld [vmem:[%s2257_s9 + $0xc8] sm:$0xff]  ;;  %v427_v42 = vld [vmem:[%s2257_s9 + $0xc0] sm:$0xff]  ;;  %v433_v5 = vld [vmem:[%s2257_s9 + $0xf0] sm:$0xff] }
  0x2e   : > { %v464_v1 = vld [vmem:[%s2257_s9 + $0x1e8] sm:$0xff]  ;;  %v463_v2 = vld [vmem:[%s2257_s9 + $0x1e0] sm:$0xff]  ;;  %v430_v6 = vld [vmem:[%s2257_s9 + $0xd8] sm:$0xff] }
  0x2f   : > { %493 = vadd.xlane.f32.xlu1 %v492_v37  ;;  %580 = vadd.xlane.f32.xlu0 %v579_v38  ;;  %v425_v37 = vld [vmem:[%s2257_s9 + $0xb0] sm:$0xff]  ;;  %v422_v38 = vld [vmem:[%s2257_s9 + $0x98] sm:$0xff] }
  0x30   : > { %v534_v39 = vsel %vm467_vm0, %v425_v37, 0.0  ;;  %v525_v40 = vsel %vm467_vm0, %v422_v38, 0.0  ;;  %v465_v9 = vld [vmem:[%s2257_s9 + $0x1f0] sm:$0xff]  ;;  %v462_v10 = vld [vmem:[%s2257_s9 + $0x1d8] sm:$0xff]  ;;  %v1303_v37 = vshrl.u32 %v1300_v25, 7  ;;  %v1313_v38 = vadd.s32 4294967280, %v1301_v30 }
  0x31   : > { %v466_v13 = vld [vmem:[%s2257_s9 + $0x1f8] sm:$0xff] }
  0x32   : > { %v434_v14 = vld [vmem:[%s2257_s9 + $0xf8] sm:$0xff] }
  0x33   : > { %571 = vadd.xlane.f32.xlu1 %v570_v43  ;;  %496 = vadd.xlane.f32.xlu0 %v495_v44  ;;  %v543_v43 = vsel %vm467_vm0, %v428_v41, 0.0  ;;  %v540_v44 = vsel %vm467_vm0, %v427_v42, 0.0  ;;  %v1320_v42 = vadd.s32 4294967272, %v1301_v30 }
  0x37   : > { %589 = vadd.xlane.f32.xlu1 %v588_v47  ;;  %583 = vadd.xlane.f32.xlu0 %v582_v48  ;;  %v630_v47 = vsel %vm467_vm0, %v457_v45, 0.0  ;;  %v621_v48 = vsel %vm467_vm0, %v454_v46, 0.0 }
  0x3b   : > { %490 = vadd.xlane.f32.xlu1 %v489_v51  ;;  %592 = vadd.xlane.f32.xlu0 %v591_v52  ;;  %v639_v51 = vsel %vm467_vm0, %v460_v49, 0.0  ;;  %v636_v52 = vsel %vm467_vm0, %v459_v50, 0.0  ;;  %v2465_v50 = vsub.s32 %v1313_v38, %v1303_v37 }
  0x3f   : > { %505 = vadd.xlane.f32.xlu1 %v504_v55  ;;  %499 = vadd.xlane.f32.xlu0 %v498_v56  ;;  %v546_v55 = vsel %vm467_vm0, %v429_v53, 0.0  ;;  %v537_v56 = vsel %vm467_vm0, %v426_v54, 0.0  ;;  %v1306_v53 = vadd.s32 4294967288, %v1301_v30  ;;  %v2467_v54 = vsub.s32 %v1301_v30, %v1303_v37 }
  0x43   : > { %574 = vadd.xlane.f32.xlu1 %v573_v59  ;;  %508 = vadd.xlane.f32.xlu0 %v507_v60  ;;  %v555_v59 = vsel %vm467_vm0, %v432_v57, 0.0  ;;  %v552_v60 = vsel %vm467_vm0, %v431_v58, 0.0  ;;  %v2471_v58 = vsub.s32 %v1320_v42, %v1303_v37 }
  0x47   : > { %595 = vadd.xlane.f32.xlu1 %v594_v63  ;;  %586 = vadd.xlane.f32.xlu0 %v585_v0  ;;  %v642_v63 = vsel %vm467_vm0, %v461_v61, 0.0  ;;  %v633_v0 = vsel %vm467_vm0, %v458_v62, 0.0 }
  0x4b   : > { %604 = vadd.xlane.f32.xlu1 %v603_v3  ;;  %601 = vadd.xlane.f32.xlu0 %v600_v4  ;;  %v651_v3 = vsel %vm467_vm0, %v464_v1, 0.0  ;;  %v648_v4 = vsel %vm467_vm0, %v463_v2, 0.0 }
  0x4f   : > { %511 = vadd.xlane.f32.xlu1 %v510_v7  ;;  %502 = vadd.xlane.f32.xlu0 %v501_v8  ;;  %v558_v7 = vsel %vm467_vm0, %v433_v5, 0.0  ;;  %v549_v8 = vsel %vm467_vm0, %v430_v6, 0.0  ;;  %v2484_v6 = vsub.s32 %v1306_v53, %v1303_v37 }
  0x53   : > { %520 = vadd.xlane.f32.xlu1 %v519_v11  ;;  %517 = vadd.xlane.f32.xlu0 %v516_v12  ;;  %v654_v11 = vsel %vm467_vm0, %v465_v9, 0.0  ;;  %v645_v12 = vsel %vm467_vm0, %v462_v10, 0.0 }
  0x57   : > { %607 = vadd.xlane.f32.xlu1 %v606_v15  ;;  %598 = vadd.xlane.f32.xlu0 %v597_v16  ;;  %v657_v15 = vsel %vm467_vm0, %v466_v13, 0.0  ;;  %v561_v16 = vsel %vm467_vm0, %v434_v14, 0.0 }
  0x5b   : > { %616 = vadd.xlane.f32.xlu1 %v615_v19  ;;  %613 = vadd.xlane.f32.xlu0 %v612_v20 }
  0x5f   : > { %523 = vadd.xlane.f32.xlu1 %v522_v23  ;;  %514 = vadd.xlane.f32.xlu0 %v513_v24 }
  0x63   : > { %532 = vadd.xlane.f32.xlu1 %v531_v27  ;;  %529 = vadd.xlane.f32.xlu0 %v528_v28 }
  0x67   : > { %619 = vadd.xlane.f32.xlu1 %v618_v31  ;;  %610 = vadd.xlane.f32.xlu0 %v609_v32 }
  0x6b   : > { %628 = vadd.xlane.f32.xlu1 %v627_v35  ;;  %625 = vadd.xlane.f32.xlu0 %v624_v36 }
  0x6f   : > { %535 = vadd.xlane.f32.xlu1 %v534_v39  ;;  %526 = vadd.xlane.f32.xlu0 %v525_v40 }
  0x73   : > { %544 = vadd.xlane.f32.xlu1 %v543_v43  ;;  %541 = vadd.xlane.f32.xlu0 %v540_v44 }
  0x77   : > { %631 = vadd.xlane.f32.xlu1 %v630_v47  ;;  %622 = vadd.xlane.f32.xlu0 %v621_v48 }
  0x7b   : > { %640 = vadd.xlane.f32.xlu1 %v639_v51  ;;  %637 = vadd.xlane.f32.xlu0 %v636_v52 }
  0x7f   : > { %547 = vadd.xlane.f32.xlu1 %v546_v55  ;;  %538 = vadd.xlane.f32.xlu0 %v537_v56 }
  0x83   : > { %556 = vadd.xlane.f32.xlu1 %v555_v59  ;;  %553 = vadd.xlane.f32.xlu0 %v552_v60 }
  0x87   : > { %643 = vadd.xlane.f32.xlu1 %v642_v63  ;;  %634 = vadd.xlane.f32.xlu0 %v633_v0 }
  0x8b   : > { %652 = vadd.xlane.f32.xlu1 %v651_v3  ;;  %649 = vadd.xlane.f32.xlu0 %v648_v4 }
  0x8f   : > { %559 = vadd.xlane.f32.xlu1 %v558_v7  ;;  %550 = vadd.xlane.f32.xlu0 %v549_v8 }
  0x93   : > { %655 = vadd.xlane.f32.xlu1 %v654_v11  ;;  %646 = vadd.xlane.f32.xlu0 %v645_v12 }
  0x97   : > { %658 = vadd.xlane.f32.xlu1 %v657_v15  ;;  %562 = vadd.xlane.f32.xlu0 %v561_v16 }
  0xa8   : > { %v2416_v17 = vpop.xlane.xlu1 %475  ;;  %v2418_v18 = vpop.xlane.xlu0 %469 }
  0xa9   : > { %v662_v19 = vadd.f32 1e-20, %v2416_v17  ;;  %v660_v20 = vadd.f32 1e-20, %v2418_v18 }
  0xab   : > { %2011 = vrcp.f32 %v662_v19 }
  0xac   : > { %2013 = vrcp.f32 %v660_v20  ;;  %v2422_v21 = vpop.xlane.xlu1 %478  ;;  %v2424_v22 = vpop.xlane.xlu0 %472 }
  0xad   : > { %v663_v23 = vadd.f32 1e-20, %v2422_v21  ;;  %v2428_v24 = vadd.f32 1e-20, %v2424_v22 }
  0xaf   : > { %2015 = vrcp.f32 %v663_v23 }
  0xb0   : > { %2017 = vrcp.f32 %v2428_v24  ;;  %v2431_v26 = vpop.xlane.xlu1 %484  ;;  %v2433_v27 = vpop.xlane.xlu0 %481 }
  0xb1   : > { %v2436_v28 = vadd.f32 1e-20, %v2431_v26  ;;  %v2439_v29 = vadd.f32 1e-20, %v2433_v27 }
  0xb3   : > { %2019 = vrcp.f32 %v2436_v28 }
  0xb4   : > { %2021 = vrcp.f32 %v2439_v29  ;;  %v2443_v31 = vpop.xlane.xlu1 %565  ;;  %v2445_v32 = vpop.xlane.xlu0 %487 }
  0xb5   : > { %v2012_v33 = vpop.eup %2011  ;;  %v2448_v34 = vadd.f32 1e-20, %v2443_v31  ;;  %v2451_v35 = vadd.f32 1e-20, %v2445_v32 }
  0xb6   : > { %v2014_v36 = vpop.eup %2013  ;;  %v790_v39 = vmul.f32 %v2012_v33, %v662_v19 }
  0xb7   : > { %v788_v40 = vmul.f32 %v2014_v36, %v660_v20  ;;  %2023 = vrcp.f32 %v2448_v34 }
  0xb8   : > { %v854_v41 = vsub.f32 2.0, %v790_v39  ;;  %2025 = vrcp.f32 %v2451_v35  ;;  %v2455_v43 = vpop.xlane.xlu1 %577  ;;  %v2457_v44 = vpop.xlane.xlu0 %568 }
  0xb9   : > { %v2016_v45 = vpop.eup %2015  ;;  %v852_v46 = vsub.f32 2.0, %v788_v40  ;;  %v2460_v47 = vadd.f32 1e-20, %v2455_v43  ;;  %v2463_v48 = vadd.f32 1e-20, %v2457_v44 }
  0xba   : > { %v2018_v49 = vpop.eup %2017  ;;  %v918_v51 = vmul.f32 %v2012_v33, %v854_v41  ;;  %v791_v52 = vmul.f32 %v2016_v45, %v663_v23 }
  0xbb   : > { %v916_v55 = vmul.f32 %v2014_v36, %v852_v46  ;;  %v789_v56 = vmul.f32 %v2018_v49, %v2428_v24  ;;  %2027 = vrcp.f32 %v2460_v47 }
  0xbc   : > { %v982_v57 = vmul.f32 %v918_v51, %v662_v19  ;;  %v855_v59 = vsub.f32 2.0, %v791_v52  ;;  %2029 = vrcp.f32 %v2463_v48  ;;  %v2474_v60 = vpop.xlane.xlu1 %493  ;;  %v2476_v61 = vpop.xlane.xlu0 %580 }
  0xbd   : > { %v2020_v62 = vpop.eup %2019  ;;  %v980_v63 = vmul.f32 %v916_v55, %v660_v20  ;;  %v853_v0 = vsub.f32 2.0, %v789_v56  ;;  %v2479_v1 = vadd.f32 1e-20, %v2474_v60  ;;  %v2482_v2 = vadd.f32 1e-20, %v2476_v61 }
  0xbe   : > { %v2022_v3 = vpop.eup %2021  ;;  %v1046_v4 = vsub.f32 2.0, %v982_v57  ;;  %v919_v5 = vmul.f32 %v2016_v45, %v855_v59  ;;  %v793_v7 = vmul.f32 %v2020_v62, %v2436_v28 }
  0xbf   : > { %v1044_v8 = vsub.f32 2.0, %v980_v63  ;;  %v917_v9 = vmul.f32 %v2018_v49, %v853_v0  ;;  %v792_v10 = vmul.f32 %v2022_v3, %v2439_v29  ;;  %2031 = vrcp.f32 %v2479_v1 }
  0xc0   : > { %v1110_v11 = vmul.f32 %v1046_v4, %v918_v51  ;;  %v983_v12 = vmul.f32 %v919_v5, %v663_v23  ;;  %v857_v13 = vsub.f32 2.0, %v793_v7  ;;  %v2489_v14 = vpop.xlane.xlu1 %571  ;;  %v2491_v15 = vpop.xlane.xlu0 %496  ;;  %2033 = vrcp.f32 %v2482_v2 }
  0xc1   : > { %v2024_v16 = vpop.eup %2023  ;;  %v1108_v19 = vmul.f32 %v1044_v8, %v916_v55  ;;  %v981_v20 = vmul.f32 %v917_v9, %v2428_v24  ;;  %v856_v25 = vsub.f32 2.0, %v792_v10  ;;  %v2501_v45 = vadd.f32 1e-20, %v2489_v14 }
  0xc2   : > { %v2026_v30 = vpop.eup %2025  ;;  %v1174_v33 = vmul.f32 %v1110_v11, %v2416_v17  ;;  %v1047_v36 = vsub.f32 2.0, %v983_v12  ;;  %v921_v37 = vmul.f32 %v2020_v62, %v857_v13  ;;  %v820_v23 = vmul.f32 %v2024_v16, %v2448_v34 }
  0xc3   : > { %v1045_v38 = vsub.f32 2.0, %v981_v20  ;;  %v920_v39 = vmul.f32 %v2022_v3, %v856_v25  ;;  %v794_v40 = vmul.f32 %v2026_v30, %v2451_v35  ;;  %v1172_v41 = vmul.f32 %v1108_v19, %v2418_v18 }
  0xc4   : > { %v985_v42 = vmul.f32 %v921_v37, %v2436_v28  ;;  %v884_v24 = vsub.f32 2.0, %v820_v23  ;;  %v2503_v46 = vpop.xlane.xlu1 %589  ;;  %v2505_v17 = vpop.xlane.xlu0 %583  ;;  %v1317_v51 = vrot.slane %v1174_v33, %v2465_v50  ;;  %v1111_v57 = vmul.f32 %v1047_v36, %v919_v5 }
  0xc5   : > { %v2028_v49 = vpop.eup %2027  ;;  %v1109_v52 = vmul.f32 %v1045_v38, %v917_v9  ;;  %v984_v53 = vmul.f32 %v920_v39, %v2439_v29  ;;  %v858_v55 = vsub.f32 2.0, %v794_v40  ;;  %v1305_v4 = vrot.slane %v1172_v41, %v2467_v54 }
  0xc6   : > { %v2030_v56 = vpop.eup %2029  ;;  %v1049_v18 = vsub.f32 2.0, %v985_v42  ;;  %v948_v59 = vmul.f32 %v2024_v16, %v884_v24  ;;  %v824_v28 = vmul.f32 %v2028_v49, %v2460_v47  ;;  %2035 = vrcp.f32 %v2501_v45 }
  0xc7   : > { %v1173_v62 = vmul.f32 %v1109_v52, %v2424_v22  ;;  %v1048_v63 = vsub.f32 2.0, %v984_v53  ;;  %v922_v0 = vmul.f32 %v2026_v30, %v858_v55  ;;  %v821_v3 = vmul.f32 %v2030_v56, %v2463_v48 }
  0xc8   : > { %v1113_v7 = vmul.f32 %v1049_v18, %v921_v37  ;;  %v1012_v8 = vmul.f32 %v948_v59, %v2448_v34  ;;  %v888_v9 = vsub.f32 2.0, %v824_v28  ;;  %v2514_v29 = vpop.xlane.xlu1 %490  ;;  %v2516_v10 = vpop.xlane.xlu0 %592 }
  0xc9   : > { %v2032_v5 = vpop.eup %2031  ;;  %v1310_v11 = vrot.slane %v1173_v62, %v2484_v6  ;;  %v1112_v12 = vmul.f32 %v1048_v63, %v920_v39  ;;  %v986_v22 = vmul.f32 %v922_v0, %v2451_v35  ;;  %v885_v13 = vsub.f32 2.0, %v821_v3 }
  0xca   : > { %v1177_v16 = vmul.f32 %v1113_v7, %v2431_v26  ;;  %v1076_v19 = vsub.f32 2.0, %v1012_v8  ;;  %v952_v20 = vmul.f32 %v2028_v49, %v888_v9  ;;  %v796_v25 = vmul.f32 %v2032_v5, %v2479_v1  ;;  %v2034_v34 = vpop.eup %2033 }
  0xcb   : > { %v1312_v30 = vsel %vm1311_vm3, %v1310_v11, %v1305_v4  ;;  %v1176_v33 = vmul.f32 %v1112_v12, %v2433_v27  ;;  %v1050_v36 = vsub.f32 2.0, %v986_v22  ;;  %v949_v37 = vmul.f32 %v2030_v56, %v885_v13 }
  0xcc   : > { %v1319_v23 = vsel %vm1318_vm4, %v1317_v51, %v1312_v30  ;;  %v1334_v38 = vrot.slane %v1177_v16, %v2484_v6  ;;  %v1140_v35 = vmul.f32 %v1076_v19, %v948_v59  ;;  %v1016_v39 = vmul.f32 %v952_v20, %v2460_v47  ;;  %v2527_v26 = vpop.xlane.xlu1 %505  ;;  %v2529_v40 = vpop.xlane.xlu0 %499 }
  0xcd   : > { %v1330_v41 = vrot.slane %v1176_v33, %v2467_v54  ;;  %v1114_v42 = vmul.f32 %v1050_v36, %v922_v0  ;;  %v1013_v24 = vmul.f32 %v949_v37, %v2463_v48  ;;  %v860_v49 = vsub.f32 2.0, %v796_v25 }
  0xce   : > { %v1175_v27 = vmul.f32 %v1111_v57, %v2422_v21  ;;  %v1080_v52 = vsub.f32 2.0, %v1016_v39  ;;  %v825_v51 = vmul.f32 %v2034_v34, %v2482_v2  ;;  %v1204_v18 = vmul.f32 %v1140_v35, %v2443_v31 }
  0xcf   : > { %v1335_v53 = vsel %vm1311_vm3, %v1334_v38, %v1330_v41  ;;  %v1178_v47 = vmul.f32 %v1114_v42, %v2445_v32  ;;  %v1077_v55 = vsub.f32 2.0, %v1013_v24  ;;  %v924_v56 = vmul.f32 %v2032_v5, %v860_v49 }
  0xd0   : > { %v1144_v59 = vmul.f32 %v1080_v52, %v952_v20  ;;  %v889_v28 = vsub.f32 2.0, %v825_v51  ;;  %v2540_v48 = vadd.f32 1e-20, %v2491_v15  ;;  %v2542_v62 = vpop.xlane.xlu1 %574  ;;  %v2544_v21 = vpop.xlane.xlu0 %508  ;;  %v2549_v32 = vadd.f32 1e-20, %v2503_v46 }
  0xd1   : > { %v1339_v57 = vrot.slane %v1178_v47, %v2465_v50  ;;  %v1141_v63 = vmul.f32 %v1077_v55, %v949_v37  ;;  %v988_v0 = vmul.f32 %v924_v56, %v2479_v1  ;;  %v1324_v3 = vrot.slane %v1175_v27, %v2471_v58  ;;  %v2036_v33 = vpop.eup %2035 }
  0xd2   : > { %v953_v31 = vmul.f32 %v2034_v34, %v889_v28  ;;  %2037 = vrcp.f32 %v2540_v48  ;;  %v2554_v4 = vadd.f32 1e-20, %v2505_v17  ;;  %v1463_v1 = vrot.slane %v1204_v18, %v2467_v54 }
  0xd3   : > { %v2557_v7 = vsel %vm1318_vm4, %v1339_v57, %v1335_v53  ;;  %v1205_v8 = vmul.f32 %v1141_v63, %v2457_v44  ;;  %v1052_v9 = vsub.f32 2.0, %v988_v0  ;;  %2039 = vrcp.f32 %v2549_v32 }
  0xd4   : > { %v1017_v5 = vmul.f32 %v953_v31, %v2482_v2  ;;  %2041 = vrcp.f32 %v2554_v4  ;;  %v2565_v11 = vadd.f32 1e-20, %v2514_v29  ;;  %v2567_v12 = vpop.xlane.xlu1 %595  ;;  %v2569_v22 = vpop.xlane.xlu0 %586  ;;  %v1208_v13 = vmul.f32 %v1144_v59, %v2455_v43 }
  0xd5   : > { %v1467_v44 = vrot.slane %v1205_v8, %v2484_v6  ;;  %v2574_v16 = vsel %vm1325_vm5, %v1324_v3, %v1319_v23  ;;  %v2577_v19 = vadd.f32 1e-20, %v2516_v10  ;;  %v2581_v20 = vadd.f32 1e-20, %v2527_v26 }
  0xd6   : > { %v1081_v2 = vsub.f32 2.0, %v1017_v5  ;;  %2043 = vrcp.f32 %v2565_v11  ;;  %v2584_v25 = vadd.f32 1e-20, %v2529_v40  ;;  %v1116_v43 = vmul.f32 %v1052_v9, %v924_v56 }
  0xd7   : > { %v2587_v34 = vsel %vm1311_vm3, %v1467_v44, %v1463_v1  ;;  %2045 = vrcp.f32 %v2577_v19  ;;  %v2591_v30 = vadd.f32 1e-20, %v2542_v62  ;;  %v2595_v37 = vadd.f32 1e-20, %v2544_v21 }
  0xd8   : > { %v1145_v36 = vmul.f32 %v1081_v2, %v953_v31  ;;  %2047 = vrcp.f32 %v2581_v20  ;;  %v2598_v23 = vadd.f32 1e-20, %v2567_v12  ;;  %v2600_v38 = vpop.xlane.xlu1 %604  ;;  %v2602_v35 = vpop.xlane.xlu0 %601  ;;  %v822_v39 = vmul.f32 %v2036_v33, %v2501_v45 }
  0xd9   : > { %3342 = vst [vmem:[#allocation2_spill] sm:$0xff] %v2600_v38  ;;  %3343 = vst [vmem:[#allocation3_spill] sm:$0xff] %v2602_v35  ;;  %2049 = vrcp.f32 %v2584_v25  ;;  %v2607_v41 = vadd.f32 1e-20, %v2569_v22  ;;  %v2612_v24 = vadd.f32 1e-20, %v2600_v38  ;;  %v1482_v51 = vrot.slane %v1208_v13, %v2467_v54 }
  0xda   : > { %v1209_v42 = vmul.f32 %v1145_v36, %v2476_v61  ;;  %2051 = vrcp.f32 %v2591_v30  ;;  %v886_v49 = vsub.f32 2.0, %v822_v39  ;;  %v2616_v27 = vadd.f32 1e-20, %v2602_v35 }
  0xdb   : > { %2053 = vrcp.f32 %v2595_v37  ;;  %v2620_v53 = vmul.f32 %v1116_v43, %v2474_v60 }
  0xdc   : > { %v2038_v52 = vpop.eup %2037  ;;  %v1486_v47 = vrot.slane %v1209_v42, %v2484_v6  ;;  %2055 = vrcp.f32 %v2598_v23  ;;  %v2624_v61 = vpop.xlane.xlu1 %511  ;;  %v950_v18 = vmul.f32 %v2036_v33, %v886_v49 }
  0xdd   : > { %3344 = vst [vmem:[#allocation4_spill] sm:$0xff] %v2624_v61  ;;  %v2626_v55 = vpop.xlane.xlu0 %502  ;;  %v2040_v56 = vpop.eup %2039  ;;  %v797_v59 = vmul.f32 %v2038_v52, %v2540_v48  ;;  %2057 = vrcp.f32 %v2607_v41  ;;  %v2631_v28 = vadd.f32 1e-20, %v2624_v61 }
  0xde   : > { %3345 = vst [vmem:[#allocation5_spill] sm:$0xff] %v2626_v55  ;;  %v2042_v57 = vpop.eup %2041  ;;  %v2634_v60 = vsel %vm1311_vm3, %v1486_v47, %v1482_v51  ;;  %v828_v63 = vmul.f32 %v2040_v56, %v2549_v32  ;;  %2059 = vrcp.f32 %v2612_v24  ;;  %v2639_v0 = vadd.f32 1e-20, %v2626_v55 }
  0xdf   : > { %v1014_v3 = vmul.f32 %v950_v18, %v2501_v45  ;;  %v861_v31 = vsub.f32 2.0, %v797_v59  ;;  %v826_v8 = vmul.f32 %v2042_v57, %v2554_v4  ;;  %2061 = vrcp.f32 %v2616_v27 }
  0xe0   : > { %v2044_v9 = vpop.eup %2043  ;;  %v892_v5 = vsub.f32 2.0, %v828_v63  ;;  %2063 = vrcp.f32 %v2631_v28  ;;  %v2647_v13 = vpop.xlane.xlu1 %520 }
  0xe1   : > { %3346 = vst [vmem:[#allocation6_spill] sm:$0xff] %v2647_v13  ;;  %v2649_v44 = vpop.xlane.xlu0 %517  ;;  %v2046_v2 = vpop.eup %2045  ;;  %v1078_v43 = vsub.f32 2.0, %v1014_v3  ;;  %v925_v33 = vmul.f32 %v2038_v52, %v861_v31  ;;  %v890_v45 = vsub.f32 2.0, %v826_v8  ;;  %v795_v36 = vmul.f32 %v2044_v9, %v2565_v11 }
  0xe2   : > { %3347 = vst [vmem:[#allocation7_spill] sm:$0xff] %v2649_v44  ;;  %v2048_v39 = vpop.eup %2047  ;;  %v956_v42 = vmul.f32 %v2040_v56, %v892_v5  ;;  %v829_v49 = vmul.f32 %v2046_v2, %v2577_v19  ;;  %2065 = vrcp.f32 %v2639_v0  ;;  %v2655_v51 = vadd.f32 1e-20, %v2647_v13 }
  0xe3   : > { %v2050_v47 = vpop.eup %2049  ;;  %v1142_v59 = vmul.f32 %v1078_v43, %v950_v18  ;;  %v989_v63 = vmul.f32 %v925_v33, %v2540_v48  ;;  %v954_v1 = vmul.f32 %v2042_v57, %v890_v45  ;;  %v859_v55 = vsub.f32 2.0, %v795_v36 }
  0xe4   : > { %3348 = vst [vmem:[#allocation8_spill] sm:$0xff] %v2655_v51  ;;  %v2052_v3 = vpop.eup %2051  ;;  %v1020_v52 = vmul.f32 %v956_v42, %v2549_v32  ;;  %v893_v31 = vsub.f32 2.0, %v829_v49  ;;  %v800_v8 = vmul.f32 %v2048_v39, %v2581_v20  ;;  %v798_v56 = vmul.f32 %v2050_v47, %v2584_v25  ;;  %v2661_v5 = vpop.xlane.xlu1 %607 }
  0xe5   : > { %3349 = vst [vmem:[#allocation9_spill] sm:$0xff] %v2661_v5  ;;  %v2663_v61 = vpop.eup %2053  ;;  %v1206_v13 = vmul.f32 %v1142_v59, %v2489_v14  ;;  %v1053_v35 = vsub.f32 2.0, %v989_v63  ;;  %v1018_v18 = vmul.f32 %v954_v1, %v2554_v4  ;;  %v923_v48 = vmul.f32 %v2044_v9, %v859_v55  ;;  %v2669_v49 = vpop.xlane.xlu0 %598 }
  0xe6   : > { %v2667_v57 = vpop.eup %2055  ;;  %v1084_v43 = vsub.f32 2.0, %v1020_v52  ;;  %v957_v45 = vmul.f32 %v2046_v2, %v893_v31  ;;  %v864_v32 = vsub.f32 2.0, %v800_v8  ;;  %v862_v36 = vsub.f32 2.0, %v798_v56 }
  0xe7   : > { %v2671_v38 = vpop.eup %2057  ;;  %v1472_v5 = vrot.slane %v1206_v13, %v2465_v50  ;;  %v1117_v44 = vmul.f32 %v1053_v35, %v925_v33  ;;  %v1082_v51 = vsub.f32 2.0, %v1018_v18  ;;  %v987_v14 = vmul.f32 %v923_v48, %v2565_v11 }
  0xe8   : > { %v2675_v59 = vpop.eup %2059  ;;  %v1148_v4 = vmul.f32 %v1084_v43, %v956_v42  ;;  %v1021_v55 = vmul.f32 %v957_v45, %v2577_v19  ;;  %v928_v9 = vmul.f32 %v2048_v39, %v864_v32  ;;  %v926_v2 = vmul.f32 %v2050_v47, %v862_v36  ;;  %v2690_v39 = vpop.xlane.xlu1 %616 }
  0xe9   : > { %v2678_v63 = vpop.eup %2061  ;;  %v2682_v52 = vsel %vm1318_vm4, %v1472_v5, %v2587_v34  ;;  %v1181_v13 = vmul.f32 %v1117_v44, %v2491_v15  ;;  %v1146_v35 = vmul.f32 %v1082_v51, %v954_v1  ;;  %v1051_v33 = vsub.f32 2.0, %v987_v14  ;;  %v2698_v18 = vpop.xlane.xlu0 %613 }
  0xea   : > { %v2685_v31 = vpop.eup %2063  ;;  %v1212_v11 = vmul.f32 %v1148_v4, %v2503_v46  ;;  %v1085_v8 = vsub.f32 2.0, %v1021_v55  ;;  %v992_v42 = vmul.f32 %v928_v9, %v2581_v20  ;;  %v990_v19 = vmul.f32 %v926_v2, %v2584_v25 }
  0xeb   : > { %v1353_v47 = vrot.slane %v1181_v13, %v2484_v6  ;;  %v1210_v34 = vmul.f32 %v1146_v35, %v2505_v17  ;;  %v1115_v56 = vmul.f32 %v1051_v33, %v923_v48  ;;  %v823_v15 = vmul.f32 %v2052_v3, %v2591_v30 }
  0xec   : > { %v2695_v1 = vpop.eup %2065  ;;  %v1501_v44 = vrot.slane %v1212_v11, %v2467_v54  ;;  %v1149_v51 = vmul.f32 %v1085_v8, %v957_v45  ;;  %v1056_v46 = vsub.f32 2.0, %v992_v42  ;;  %v1054_v5 = vsub.f32 2.0, %v990_v19 }
  0xed   : > { %v3350_v20 = vrot.slane %v2620_v53, %v2467_v54  ;;  %v1491_v43 = vrot.slane %v1210_v34, %v2465_v50  ;;  %v1179_v17 = vmul.f32 %v1115_v56, %v2514_v29  ;;  %v887_v48 = vsub.f32 2.0, %v823_v15  ;;  %v2736_v19 = vpop.xlane.xlu0 %514 }
  0xee   : > { %v1213_v32 = vmul.f32 %v1149_v51, %v2516_v10  ;;  %v1120_v36 = vmul.f32 %v1056_v46, %v928_v9  ;;  %v1118_v14 = vmul.f32 %v1054_v5, %v926_v2  ;;  %v801_v45 = vmul.f32 %v2663_v61, %v2595_v37  ;;  %v2721_v2 = vpop.xlane.xlu1 %523 }
  0xef   : > { %v1354_v25 = vsel %vm1311_vm3, %v1353_v47, %v3350_v20  ;;  %v2711_v4 = vsel %vm1318_vm4, %v1491_v43, %v2634_v60  ;;  %v1344_v53 = vrot.slane %v1179_v17, %v2471_v58  ;;  %v951_v55 = vmul.f32 %v2052_v3, %v887_v48 }
  0xf0   : > { %v830_v13 = vmul.f32 %v2667_v57, %v2598_v23  ;;  %v1505_v29 = vrot.slane %v1213_v32, %v2484_v6  ;;  %v2718_v35 = vmul.f32 %v1120_v36, %v2527_v26  ;;  %v1182_v10 = vmul.f32 %v1118_v14, %v2529_v40 }
  0xf1   : > { %v865_v9 = vsub.f32 2.0, %v801_v45  ;;  %v1345_v60 = vsel %vm1325_vm5, %v1344_v53, %v2557_v7  ;;  %v1015_v33 = vmul.f32 %v951_v55, %v2591_v30  ;;  %v827_v3 = vmul.f32 %v2671_v38, %v2607_v41  ;;  %v2761_v53 = vpop.xlane.xlu0 %529 }
  0xf2   : > { %v894_v11 = vsub.f32 2.0, %v830_v13  ;;  %v2730_v8 = vsel %vm1612_vm6, %v1345_v60, %v2574_v16  ;;  %v1506_v26 = vsel %vm1311_vm3, %v1505_v29, %v1501_v44  ;;  %v1368_v40 = vrot.slane %v2718_v35, %v2467_v54  ;;  %v2754_v17 = vpop.xlane.xlu1 %532 }
  0xf3   : > { %v1358_v42 = vrot.slane %v1182_v10, %v2465_v50  ;;  %v1079_v7 = vsub.f32 2.0, %v1015_v33  ;;  %v929_v30 = vmul.f32 %v2663_v61, %v865_v9  ;;  %v891_v34 = vsub.f32 2.0, %v827_v3 }
  0xf4   : > { %v958_v47 = vmul.f32 %v2667_v57, %v894_v11  ;;  %v833_v16 = vmul.f32 %v2675_v59, %v2612_v24  ;;  %v832_v15 = vmul.f32 %v2678_v63, %v2616_v27  ;;  %v802_v44 = vmul.f32 %v2685_v31, %v2631_v28 }
  0xf5   : > { %v2741_v56 = vsel %vm1318_vm4, %v1358_v42, %v1354_v25  ;;  %v1143_v51 = vmul.f32 %v1079_v7, %v951_v55  ;;  %v993_v46 = vmul.f32 %v929_v30, %v2595_v37  ;;  %v955_v57 = vmul.f32 %v2671_v38, %v891_v34 }
  0xf6   : > { %v1022_v61 = vmul.f32 %v958_v47, %v2598_v23  ;;  %v897_v5 = vsub.f32 2.0, %v833_v16  ;;  %v896_v20 = vsub.f32 2.0, %v832_v15  ;;  %v866_v25 = vsub.f32 2.0, %v802_v44  ;;  %v3353_v15 = vld [vmem:[#allocation7_spill] sm:$0xff] }
  0xf7   : > { %v799_v43 = vmul.f32 %v2695_v1, %v2639_v0  ;;  %v1207_v48 = vmul.f32 %v1143_v51, %v2542_v62  ;;  %v1057_v32 = vsub.f32 2.0, %v993_v46  ;;  %v1019_v14 = vmul.f32 %v955_v57, %v2607_v41  ;;  %v3355_v46 = vld [vmem:[#allocation3_spill] sm:$0xff] }
  0xf8   : > { %v1086_v36 = vsub.f32 2.0, %v1022_v61  ;;  %v961_v37 = vmul.f32 %v2675_v59, %v897_v5  ;;  %v960_v23 = vmul.f32 %v2678_v63, %v896_v20  ;;  %v930_v38 = vmul.f32 %v2685_v31, %v866_v25 }
  0xf9   : > { %v863_v45 = vsub.f32 2.0, %v799_v43  ;;  %v1477_v55 = vrot.slane %v1207_v48, %v2471_v58  ;;  %v1121_v13 = vmul.f32 %v1057_v32, %v929_v30  ;;  %v1083_v35 = vsub.f32 2.0, %v1019_v14 }
  0xfa   : > { %v1150_v29 = vmul.f32 %v1086_v36, %v958_v47  ;;  %v1025_v62 = vmul.f32 %v961_v37, %v2612_v24  ;;  %v1024_v10 = vmul.f32 %v960_v23, %v2616_v27  ;;  %v994_v41 = vmul.f32 %v930_v38, %v2631_v28  ;;  %v2773_v24 = vpop.xlane.xlu1 %619  ;;  %v2779_v47 = vpop.xlane.xlu0 %610 }
  0xfb   : > { %v927_v59 = vmul.f32 %v2695_v1, %v863_v45  ;;  %v1478_v63 = vsel %vm1325_vm5, %v1477_v55, %v2682_v52  ;;  %v1185_v31 = vmul.f32 %v1121_v13, %v2544_v21  ;;  %v1147_v60 = vmul.f32 %v1083_v35, %v955_v57  ;;  %v3351_v52 = vld [vmem:[#allocation8_spill] sm:$0xff] }
  0xfc   : > { %v1214_v9 = vmul.f32 %v1150_v29, %v2567_v12  ;;  %v1089_v33 = vsub.f32 2.0, %v1025_v62  ;;  %v1088_v11 = vsub.f32 2.0, %v1024_v10  ;;  %v1058_v3 = vsub.f32 2.0, %v994_v41  ;;  %3352 = vst [vmem:[#allocation8_spill] sm:$0xff] %v2779_v47  ;;  %v3356_v57 = vld [vmem:[#allocation4_spill] sm:$0xff] }
  0xfd   : > { %v991_v42 = vmul.f32 %v927_v59, %v2639_v0  ;;  %v1372_v27 = vrot.slane %v1185_v31, %v2484_v6  ;;  %v1211_v1 = vmul.f32 %v1147_v60, %v2569_v22  ;;  %2067 = vrcp.f32 %v3351_v52  ;;  %v3354_v22 = vld [vmem:[#allocation2_spill] sm:$0xff] }
  0xfe   : > { %v1510_v28 = vrot.slane %v1214_v9, %v2465_v50  ;;  %v1153_v21 = vmul.f32 %v1089_v33, %v961_v37  ;;  %v1152_v7 = vmul.f32 %v1088_v11, %v960_v23  ;;  %v1122_v12 = vmul.f32 %v1058_v3, %v930_v38  ;;  %v2807_v37 = vpop.xlane.xlu1 %628  ;;  %v2831_v10 = vpop.xlane.xlu0 %625 }
  0xff   : > { %v1055_v30 = vsub.f32 2.0, %v991_v42  ;;  %v1373_v34 = vsel %vm1311_vm3, %v1372_v27, %v1368_v40  ;;  %v1496_v16 = vrot.slane %v1211_v1, %v2471_v58  ;;  %v2787_v44 = vadd.f32 1e-20, %v3353_v15  ;;  %v3357_v40 = vld [vmem:[#allocation9_spill] sm:$0xff]  ;;  %3358 = vst [vmem:[#allocation7_spill] sm:$0xff] %v2807_v37  ;;  %3362 = vst [vmem:[#allocation4_spill] sm:$0xff] %v2831_v10 }
 0x100   : > { %v2783_v0 = vsel %vm1318_vm4, %v1510_v28, %v1506_v26  ;;  %v1217_v51 = vmul.f32 %v1153_v21, %v3354_v22  ;;  %v1216_v61 = vmul.f32 %v1152_v7, %v3355_v46  ;;  %v1186_v5 = vmul.f32 %v1122_v12, %v3356_v57  ;;  %v2817_v55 = vpop.f32.mrb[0].mxu0  ;;  %v2819_v13 = vpop.f32.mrb[0].mxu1 }
 0x101   : > { %v1119_v20 = vmul.f32 %v1055_v30, %v927_v59  ;;  %v1497_v25 = vsel %vm1325_vm5, %v1496_v16, %v2711_v4  ;;  %2069 = vrcp.f32 %v2787_v44  ;;  %v2796_v26 = vadd.f32 1e-20, %v3357_v40  ;;  %v3359_v4 = vld [vmem:[#allocation5_spill] sm:$0xff]  ;;  %3360 = vst [vmem:[#allocation2_spill] sm:$0xff] %v2817_v55  ;;  %3361 = vst [vmem:[#allocation3_spill] sm:$0xff] %v2819_v13  ;;  %v2841_v31 = vpop.f32.mrb[1].mxu0 }
 0x102   : > { %v2799_v43 = vadd.f32 1e-20, %v2669_v49  ;;  %v2802_v48 = vsel %vm1612_vm6, %v1497_v25, %v1478_v63  ;;  %v1524_v32 = vrot.slane %v1217_v51, %v2484_v6  ;;  %v1520_v36 = vrot.slane %v1216_v61, %v2467_v54  ;;  %3363 = vst [vmem:[#allocation9_spill] sm:$0xff] %v2841_v31  ;;  %v2843_v9 = vpop.f32.mrb[1].mxu1  ;;  %v2864_v1 = vpop.xlane.xlu1 %535 }
 0x103   : > { %v1377_v14 = vrot.slane %v1186_v5, %v2465_v50  ;;  %v1183_v23 = vmul.f32 %v1119_v20, %v3359_v4  ;;  %2071 = vrcp.f32 %v2796_v26  ;;  %v2812_v38 = vadd.f32 1e-20, %v2690_v39  ;;  %3364 = vst [vmem:[#allocation5_spill] sm:$0xff] %v2843_v9  ;;  %3366 = vst [vmem:[#allocation11_spill] sm:$0xff] %v2864_v1  ;;  %v2874_v7 = vpop.xlane.xlu0 %526 }
 0x104   : > { %v2815_v45 = vadd.f32 1e-20, %v2698_v18  ;;  %v2822_v29 = vsel %vm1311_vm3, %v1524_v32, %v1520_v36  ;;  %2073 = vrcp.f32 %v2799_v43  ;;  %v2829_v62 = vadd.f32 1e-20, %v2721_v2  ;;  %3367 = vst [vmem:[#allocation12_spill] sm:$0xff] %v2874_v7 }
 0x105   : > { %v2825_v35 = vsel %vm1318_vm4, %v1377_v14, %v1373_v34  ;;  %v1363_v41 = vrot.slane %v1183_v23, %v2471_v58  ;;  %2075 = vrcp.f32 %v2812_v38  ;;  %v2836_v59 = vadd.f32 1e-20, %v2736_v19 }
 0x106   : > { %v2839_v63 = vadd.f32 1e-20, %v2754_v17  ;;  %2077 = vrcp.f32 %v2815_v45  ;;  %v2847_v60 = vadd.f32 1e-20, %v2761_v53  ;;  %v2853_v3 = vadd.f32 1e-20, %v2773_v24  ;;  %v2889_v20 = vpop.xlane.xlu1 %544 }
 0x107   : > { %v2068_v33 = vpop.eup %2067  ;;  %v1364_v11 = vsel %vm1325_vm5, %v1363_v41, %v2741_v56  ;;  %2079 = vrcp.f32 %v2829_v62  ;;  %v2862_v28 = vadd.f32 1e-20, %v2779_v47  ;;  %v2868_v56 = vadd.f32 1e-20, %v2807_v37  ;;  %3368 = vst [vmem:[#allocation13_spill] sm:$0xff] %v2889_v20  ;;  %v2902_v55 = vpop.xlane.xlu0 %541 }
 0x108   : > { %v2857_v42 = vsel %vm1614_vm7, %v1364_v11, %v2730_v8  ;;  %v805_v27 = vmul.f32 %v2068_v33, %v3351_v52  ;;  %2081 = vrcp.f32 %v2836_v59  ;;  %v2872_v8 = vadd.f32 1e-20, %v2831_v10 }
 0x109   : > { %3365 = vst [vmem:[#allocation10_spill] sm:$0xff] %v2857_v42  ;;  %2083 = vrcp.f32 %v2839_v63  ;;  %v2878_v30 = vadd.f32 1e-20, %v2864_v1  ;;  %v2884_v51 = vadd.f32 1e-20, %v2874_v7  ;;  %v3369_v42 = vld [vmem:[#allocation6_spill] sm:$0xff] }
 0x10a   : > { %v869_v21 = vsub.f32 2.0, %v805_v27  ;;  %2085 = vrcp.f32 %v2847_v60  ;;  %v2897_v27 = vadd.f32 1e-20, %v2889_v20 }
 0x10b   : > { %v2070_v12 = vpop.eup %2069  ;;  %2087 = vrcp.f32 %v2853_v3 }
 0x10c   : > { %v933_v34 = vmul.f32 %v2068_v33, %v869_v21  ;;  %v804_v16 = vmul.f32 %v2070_v12, %v2787_v44  ;;  %2089 = vrcp.f32 %v2862_v28 }
 0x10d   : > { %v2072_v22 = vpop.eup %2071  ;;  %2091 = vrcp.f32 %v2868_v56 }
 0x10e   : > { %v2074_v46 = vpop.eup %2073  ;;  %v997_v61 = vmul.f32 %v933_v34, %v3351_v52  ;;  %v868_v57 = vsub.f32 2.0, %v804_v16  ;;  %v834_v5 = vmul.f32 %v2072_v22, %v2796_v26  ;;  %2093 = vrcp.f32 %v2872_v8 }
 0x10f   : > { %v2076_v25 = vpop.eup %2075  ;;  %v831_v32 = vmul.f32 %v2074_v46, %v2799_v43  ;;  %2095 = vrcp.f32 %v2878_v30 }
 0x110   : > { %v2078_v36 = vpop.eup %2077  ;;  %v1061_v14 = vsub.f32 2.0, %v997_v61  ;;  %v932_v4 = vmul.f32 %v2070_v12, %v868_v57  ;;  %v898_v23 = vsub.f32 2.0, %v834_v5  ;;  %v837_v41 = vmul.f32 %v2076_v25, %v2812_v38 }
 0x111   : > { %v2080_v33 = vpop.eup %2079  ;;  %v895_v52 = vsub.f32 2.0, %v831_v32  ;;  %v836_v11 = vmul.f32 %v2078_v36, %v2815_v45  ;;  %2097 = vrcp.f32 %v2884_v51 }
 0x112   : > { %v2082_v21 = vpop.eup %2081  ;;  %v1125_v16 = vmul.f32 %v1061_v14, %v933_v34  ;;  %v996_v9 = vmul.f32 %v932_v4, %v2787_v44  ;;  %v962_v13 = vmul.f32 %v2072_v22, %v898_v23  ;;  %v901_v31 = vsub.f32 2.0, %v837_v41 }
 0x113   : > { %v2084_v61 = vpop.eup %2083  ;;  %v959_v12 = vmul.f32 %v2074_v46, %v895_v52  ;;  %v900_v57 = vsub.f32 2.0, %v836_v11  ;;  %v806_v5 = vmul.f32 %v2080_v33, %v2829_v62  ;;  %v803_v32 = vmul.f32 %v2082_v21, %v2836_v59 }
 0x114   : > { %v2904_v1 = vpop.eup %2085  ;;  %v1189_v20 = vmul.f32 %v1125_v16, %v3369_v42  ;;  %v1060_v7 = vsub.f32 2.0, %v996_v9  ;;  %v1026_v34 = vmul.f32 %v962_v13, %v2796_v26  ;;  %v965_v14 = vmul.f32 %v2076_v25, %v901_v31  ;;  %v2918_v16 = vpop.xlane.xlu1 %631 }
 0x115   : > { %v2908_v44 = vpop.eup %2087  ;;  %v1023_v22 = vmul.f32 %v959_v12, %v2799_v43  ;;  %v964_v46 = vmul.f32 %v2078_v36, %v900_v57  ;;  %v870_v23 = vsub.f32 2.0, %v806_v5  ;;  %v867_v41 = vsub.f32 2.0, %v803_v32 }
 0x116   : > { %v2911_v52 = vpop.eup %2089  ;;  %v1391_v11 = vrot.slane %v1189_v20, %v2484_v6  ;;  %v1124_v10 = vmul.f32 %v1060_v7, %v932_v4  ;;  %v1090_v37 = vsub.f32 2.0, %v1026_v34  ;;  %v1029_v47 = vmul.f32 %v965_v14, %v2812_v38 }
 0x117   : > { %v2915_v42 = vpop.eup %2091  ;;  %v1087_v9 = vsub.f32 2.0, %v1023_v22  ;;  %v1028_v26 = vmul.f32 %v964_v46, %v2815_v45  ;;  %v934_v31 = vmul.f32 %v2080_v33, %v870_v23  ;;  %v931_v25 = vmul.f32 %v2082_v21, %v867_v41  ;;  %v2928_v33 = vpop.xlane.xlu0 %622 }
 0x118   : > { %v2920_v43 = vpop.eup %2093  ;;  %v1188_v36 = vmul.f32 %v1124_v10, %v3353_v15  ;;  %v1154_v57 = vmul.f32 %v1090_v37, %v962_v13  ;;  %v1093_v5 = vsub.f32 2.0, %v1029_v47  ;;  %v809_v7 = vmul.f32 %v2084_v61, %v2839_v63 }
 0x119   : > { %v2924_v20 = vpop.eup %2095  ;;  %v1151_v38 = vmul.f32 %v1087_v9, %v959_v12  ;;  %v1092_v4 = vsub.f32 2.0, %v1028_v26  ;;  %v998_v32 = vmul.f32 %v934_v31, %v2829_v62  ;;  %v995_v45 = vmul.f32 %v931_v25, %v2836_v59 }
 0x11a   : > { %v1387_v21 = vrot.slane %v1188_v36, %v2467_v54  ;;  %v1218_v34 = vmul.f32 %v1154_v57, %v3357_v40  ;;  %v1157_v22 = vmul.f32 %v1093_v5, %v965_v14  ;;  %v873_v15 = vsub.f32 2.0, %v809_v7  ;;  %v2940_v36 = vpop.xlane.xlu1 %640 }
 0x11b   : > { %v2932_v37 = vpop.eup %2097  ;;  %v1215_v47 = vmul.f32 %v1151_v38, %v2669_v49  ;;  %v1156_v13 = vmul.f32 %v1092_v4, %v964_v46  ;;  %v1062_v10 = vsub.f32 2.0, %v998_v32  ;;  %v1059_v12 = vsub.f32 2.0, %v995_v45  ;;  %v2955_v57 = vpop.xlane.xlu0 %637 }
 0x11c   : > { %v1392_v23 = vsel %vm1311_vm3, %v1391_v11, %v1387_v21  ;;  %v1529_v62 = vrot.slane %v1218_v34, %v2465_v50  ;;  %v1221_v59 = vmul.f32 %v1157_v22, %v2690_v39  ;;  %v937_v41 = vmul.f32 %v2084_v61, %v873_v15 }
 0x11d   : > { %v1515_v9 = vrot.slane %v1215_v47, %v2471_v58  ;;  %v1220_v40 = vmul.f32 %v1156_v13, %v2698_v18  ;;  %v1126_v14 = vmul.f32 %v1062_v10, %v934_v31  ;;  %v1123_v26 = vmul.f32 %v1059_v12, %v931_v25 }
 0x11e   : > { %v2944_v49 = vsel %vm1318_vm4, %v1529_v62, %v2822_v29  ;;  %v1543_v46 = vrot.slane %v1221_v59, %v2484_v6  ;;  %v1001_v11 = vmul.f32 %v937_v41, %v2839_v63  ;;  %v808_v39 = vmul.f32 %v2904_v1, %v2847_v60  ;;  %v2982_v47 = vpop.xlane.xlu1 %547 }
 0x11f   : > { %v1516_v61 = vsel %vm1325_vm5, %v1515_v9, %v2783_v0  ;;  %v1539_v18 = vrot.slane %v1220_v40, %v2467_v54  ;;  %v1190_v31 = vmul.f32 %v1126_v14, %v2721_v2  ;;  %v1187_v25 = vmul.f32 %v1123_v26, %v2736_v19 }
 0x120   : > { %v2959_v29 = vsel %vm1614_vm7, %v1516_v61, %v2802_v48  ;;  %v1065_v5 = vsub.f32 2.0, %v1001_v11  ;;  %v872_v63 = vsub.f32 2.0, %v808_v39  ;;  %v838_v7 = vmul.f32 %v2908_v44, %v2853_v3 }
 0x121   : > { %v2964_v38 = vsel %vm1311_vm3, %v1543_v46, %v1539_v18  ;;  %v1396_v0 = vrot.slane %v1190_v31, %v2465_v50  ;;  %v1382_v2 = vrot.slane %v1187_v25, %v2471_v58  ;;  %v835_v19 = vmul.f32 %v2911_v52, %v2862_v28 }
 0x122   : > { %v1129_v4 = vmul.f32 %v1065_v5, %v937_v41  ;;  %v936_v32 = vmul.f32 %v2904_v1, %v872_v63  ;;  %v902_v48 = vsub.f32 2.0, %v838_v7  ;;  %v841_v45 = vmul.f32 %v2915_v42, %v2868_v56  ;;  %v2993_v41 = vpop.xlane.xlu0 %538  ;;  %v3011_v31 = vpop.xlane.xlu1 %556 }
 0x123   : > { %v2974_v21 = vsel %vm1318_vm4, %v1396_v0, %v1392_v23  ;;  %v2978_v34 = vsel %vm1325_vm5, %v1382_v2, %v2825_v35  ;;  %v899_v22 = vsub.f32 2.0, %v835_v19  ;;  %v840_v15 = vmul.f32 %v2920_v43, %v2872_v8 }
 0x124   : > { %v1000_v13 = vmul.f32 %v936_v32, %v2847_v60  ;;  %v966_v1 = vmul.f32 %v2908_v44, %v902_v48  ;;  %v905_v10 = vsub.f32 2.0, %v841_v45  ;;  %v2987_v12 = vadd.f32 1e-20, %v2902_v55 }
 0x125   : > { %v1193_v23 = vmul.f32 %v1129_v4, %v2754_v17  ;;  %v963_v62 = vmul.f32 %v2911_v52, %v899_v22  ;;  %v904_v35 = vsub.f32 2.0, %v840_v15  ;;  %v807_v59 = vmul.f32 %v2932_v37, %v2884_v51  ;;  %v3371_v4 = vld [vmem:[#allocation8_spill] sm:$0xff]  ;;  %v3372_v22 = vld [vmem:[#allocation7_spill] sm:$0xff] }
 0x126   : > { %v1064_v9 = vsub.f32 2.0, %v1000_v13  ;;  %v1030_v40 = vmul.f32 %v966_v1, %v2853_v3  ;;  %v969_v60 = vmul.f32 %v2915_v42, %v905_v10  ;;  %v810_v44 = vmul.f32 %v2924_v20, %v2878_v30  ;;  %v3016_v2 = vpop.xlane.xlu0 %553  ;;  %v3373_v13 = vld [vmem:[#allocation4_spill] sm:$0xff] }
 0x127   : > { %v1027_v14 = vmul.f32 %v963_v62, %v2862_v28  ;;  %v968_v17 = vmul.f32 %v2920_v43, %v904_v35  ;;  %v871_v26 = vsub.f32 2.0, %v807_v59  ;;  %v3002_v52 = vadd.f32 1e-20, %v2918_v16  ;;  %3370 = vst [vmem:[#allocation6_spill] sm:$0xff] %v3016_v2 }
 0x128   : > { %v1128_v46 = vmul.f32 %v1064_v9, %v936_v32  ;;  %v1094_v11 = vsub.f32 2.0, %v1030_v40  ;;  %v1033_v39 = vmul.f32 %v969_v60, %v2868_v56  ;;  %v3006_v61 = vadd.f32 1e-20, %v2928_v33 }
 0x129   : > { %v1410_v3 = vrot.slane %v1193_v23, %v2484_v6  ;;  %v1091_v42 = vsub.f32 2.0, %v1027_v14  ;;  %v1032_v18 = vmul.f32 %v968_v17, %v2872_v8  ;;  %v935_v28 = vmul.f32 %v2932_v37, %v871_v26  ;;  %v3375_v14 = vld [vmem:[#allocation12_spill] sm:$0xff] }
 0x12a   : > { %v1192_v43 = vmul.f32 %v1128_v46, %v2761_v53  ;;  %v1158_v25 = vmul.f32 %v1094_v11, %v966_v1  ;;  %v1097_v5 = vsub.f32 2.0, %v1033_v39  ;;  %v874_v63 = vsub.f32 2.0, %v810_v44  ;;  %v3052_v46 = vpop.xlane.xlu0 %634 }
 0x12b   : > { %v1155_v7 = vmul.f32 %v1091_v42, %v963_v62  ;;  %v1096_v0 = vsub.f32 2.0, %v1032_v18  ;;  %v999_v56 = vmul.f32 %v935_v28, %v2884_v51  ;;  %2099 = vrcp.f32 %v2897_v27  ;;  %v3034_v62 = vpop.xlane.xlu1 %643 }
 0x12c   : > { %v1406_v19 = vrot.slane %v1192_v43, %v2467_v54  ;;  %v1222_v8 = vmul.f32 %v1158_v25, %v2773_v24  ;;  %v1161_v37 = vmul.f32 %v1097_v5, %v969_v60  ;;  %2101 = vrcp.f32 %v3002_v52  ;;  %3374 = vst [vmem:[#allocation8_spill] sm:$0xff] %v3034_v62 }
 0x12d   : > { %v1219_v53 = vmul.f32 %v1155_v7, %v3371_v4  ;;  %v1160_v32 = vmul.f32 %v1096_v0, %v968_v17  ;;  %v1063_v48 = vsub.f32 2.0, %v999_v56  ;;  %2103 = vrcp.f32 %v2987_v12  ;;  %v3378_v56 = vld [vmem:[#allocation10_spill] sm:$0xff] }
 0x12e   : > { %v3024_v45 = vsel %vm1311_vm3, %v1410_v3, %v1406_v19  ;;  %v1548_v51 = vrot.slane %v1222_v8, %v2465_v50  ;;  %v1225_v15 = vmul.f32 %v1161_v37, %v3372_v22  ;;  %2105 = vrcp.f32 %v3006_v61 }
 0x12f   : > { %v1534_v24 = vrot.slane %v1219_v53, %v2471_v58  ;;  %v1224_v1 = vmul.f32 %v1160_v32, %v3373_v13  ;;  %v1127_v10 = vmul.f32 %v1063_v48, %v935_v28  ;;  %v3032_v23 = vadd.f32 1e-20, %v2940_v36  ;;  %v3065_v3 = vpop.xlane.xlu1 %652 }
 0x130   : > { %v3038_v35 = vsel %vm1318_vm4, %v1548_v51, %v2964_v38  ;;  %v1562_v59 = vrot.slane %v1225_v15, %v2484_v6  ;;  %v938_v9 = vmul.f32 %v2924_v20, %v874_v63  ;;  %v3043_v40 = vadd.f32 1e-20, %v2955_v57  ;;  %3376 = vst [vmem:[#allocation7_spill] sm:$0xff] %v3065_v3 }
 0x131   : > { %v1535_v60 = vsel %vm1325_vm5, %v1534_v24, %v2944_v49  ;;  %v1558_v44 = vrot.slane %v1224_v1, %v2467_v54  ;;  %v1191_v17 = vmul.f32 %v1127_v10, %v3375_v14  ;;  %v3050_v26 = vadd.f32 1e-20, %v2982_v47 }
 0x132   : > { %v3055_v38 = vadd.f32 1e-20, %v2993_v41  ;;  %2107 = vrcp.f32 %v3032_v23  ;;  %v1002_v49 = vmul.f32 %v938_v9, %v2878_v30  ;;  %v3072_v25 = vadd.f32 1e-20, %v3011_v31  ;;  %v3074_v30 = vpop.xlane.xlu0 %649 }
 0x133   : > { %v3058_v20 = vsel %vm1311_vm3, %v1562_v59, %v1558_v44  ;;  %v1401_v11 = vrot.slane %v1191_v17, %v2471_v58  ;;  %2109 = vrcp.f32 %v3043_v40  ;;  %3377 = vst [vmem:[#allocation4_spill] sm:$0xff] %v3074_v30  ;;  %v3078_v0 = vsel %vm1616_vm8, %v1535_v60, %v2959_v29  ;;  %v3096_v51 = vpop.xlane.xlu1 %559 }
 0x134   : > { %2111 = vrcp.f32 %v3050_v26  ;;  %v1066_v63 = vsub.f32 2.0, %v1002_v49  ;;  %v1617_v19 = vsel %vm1616_vm8, %v2978_v34, %v3378_v56  ;;  %v3084_v8 = vadd.f32 1e-20, %v3016_v2  ;;  %3379 = vst [vmem:[#allocation12_spill] sm:$0xff] %v3096_v51 }
 0x135   : > { %v2100_v39 = vpop.eup %2099  ;;  %2113 = vrcp.f32 %v3055_v38  ;;  %v1402_v28 = vsel %vm1325_vm5, %v1401_v11, %v2974_v21  ;;  %v3088_v53 = vadd.f32 1e-20, %v3052_v46  ;;  %v3094_v29 = vadd.f32 1e-20, %v3034_v62  ;;  %v3381_v11 = vld [vmem:[#allocation11_spill] sm:$0xff] }
 0x136   : > { %v2102_v42 = vpop.eup %2101  ;;  %v813_v7 = vmul.f32 %v2100_v39, %v2897_v27  ;;  %v3091_v32 = vsel %vm1618_vm9, %v1402_v28, %v1617_v19  ;;  %v1130_v34 = vmul.f32 %v1066_v63, %v938_v9  ;;  %2115 = vrcp.f32 %v3072_v25  ;;  %v3103_v1 = vpop.xlane.xlu0 %550 }
 0x137   : > { %v2104_v18 = vpop.eup %2103  ;;  %v842_v43 = vmul.f32 %v2102_v42, %v3002_v52  ;;  %2117 = vrcp.f32 %v3084_v8  ;;  %v3101_v13 = vadd.f32 1e-20, %v3065_v3  ;;  %3380 = vst [vmem:[#allocation10_spill] sm:$0xff] %v3103_v1  ;;  %v3109_v14 = vadd.f32 1e-20, %v3074_v30 }
 0x138   : > { %v2106_v5 = vpop.eup %2105  ;;  %v812_v37 = vmul.f32 %v2104_v18, %v2987_v12  ;;  %v877_v22 = vsub.f32 2.0, %v813_v7  ;;  %2119 = vrcp.f32 %v3088_v53  ;;  %v1194_v49 = vmul.f32 %v1130_v34, %v3381_v11 }
 0x139   : > { %v839_v21 = vmul.f32 %v2106_v5, %v3006_v61  ;;  %v906_v4 = vsub.f32 2.0, %v842_v43  ;;  %2121 = vrcp.f32 %v3094_v29  ;;  %v3128_v2 = vadd.f32 1e-20, %v3096_v51 }
 0x13a   : > { %v876_v59 = vsub.f32 2.0, %v812_v37  ;;  %v941_v28 = vmul.f32 %v2100_v39, %v877_v22  ;;  %2123 = vrcp.f32 %v3101_v13  ;;  %v3121_v39 = vpop.xlane.xlu0 %646  ;;  %v1415_v37 = vrot.slane %v1194_v49, %v2465_v50 }
 0x13b   : > { %v903_v48 = vsub.f32 2.0, %v839_v21  ;;  %v970_v60 = vmul.f32 %v2102_v42, %v906_v4  ;;  %v3115_v42 = vpop.xlane.xlu1 %655  ;;  %2125 = vrcp.f32 %v3109_v14  ;;  %3383 = vst [vmem:[#allocation14_spill] sm:$0xff] %v3121_v39  ;;  %v3131_v30 = vadd.f32 1e-20, %v3103_v1 }
 0x13c   : > { %v2108_v15 = vpop.eup %2107  ;;  %3382 = vst [vmem:[#allocation11_spill] sm:$0xff] %v3115_v42  ;;  %v940_v7 = vmul.f32 %v2104_v18, %v876_v59  ;;  %v1005_v4 = vmul.f32 %v941_v28, %v2897_v27  ;;  %2127 = vrcp.f32 %v3128_v2 }
 0x13d   : > { %v967_v24 = vmul.f32 %v2106_v5, %v903_v48  ;;  %v2110_v10 = vpop.eup %2109  ;;  %v845_v5 = vmul.f32 %v2108_v15, %v3032_v23  ;;  %2129 = vrcp.f32 %v3131_v30 }
 0x13e   : > { %v2112_v44 = vpop.eup %2111  ;;  %v844_v63 = vmul.f32 %v2110_v10, %v3043_v40  ;;  %v1004_v18 = vmul.f32 %v940_v7, %v2987_v12 }
 0x13f   : > { %v1031_v9 = vmul.f32 %v967_v24, %v3006_v61  ;;  %v2114_v17 = vpop.eup %2113  ;;  %v1034_v61 = vmul.f32 %v970_v60, %v3002_v52  ;;  %v814_v21 = vmul.f32 %v2112_v44, %v3050_v26  ;;  %v909_v34 = vsub.f32 2.0, %v845_v5  ;;  %v3133_v49 = vpop.xlane.xlu1 %658 }
 0x140   : > { %v811_v56 = vmul.f32 %v2114_v17, %v3055_v38  ;;  %v908_v22 = vsub.f32 2.0, %v844_v63  ;;  %3384 = vst [vmem:[#allocation15_spill] sm:$0xff] %v3133_v49  ;;  %v1416_v5 = vsel %vm1318_vm4, %v1415_v37, %v3024_v45  ;;  %v1069_v63 = vsub.f32 2.0, %v1005_v4 }
 0x141   : > { %v1095_v43 = vsub.f32 2.0, %v1031_v9  ;;  %v2116_v9 = vpop.eup %2115  ;;  %v1098_v52 = vsub.f32 2.0, %v1034_v61  ;;  %v973_v61 = vmul.f32 %v2108_v15, %v909_v34  ;;  %v1068_v1 = vsub.f32 2.0, %v1004_v18 }
 0x142   : > { %v875_v48 = vsub.f32 2.0, %v811_v56  ;;  %v2118_v11 = vpop.eup %2117  ;;  %v972_v56 = vmul.f32 %v2110_v10, %v908_v22  ;;  %v3148_v45 = vadd.f32 1e-20, %v3133_v49  ;;  %v1133_v34 = vmul.f32 %v1069_v63, %v941_v28 }
 0x143   : > { %v1159_v19 = vmul.f32 %v1095_v43, %v967_v24  ;;  %v878_v43 = vsub.f32 2.0, %v814_v21  ;;  %v2120_v27 = vpop.eup %2119  ;;  %v3143_v21 = vadd.f32 1e-20, %v3121_v39  ;;  %v1162_v51 = vmul.f32 %v1098_v52, %v970_v60 }
 0x144   : > { %v939_v59 = vmul.f32 %v2114_v17, %v875_v48  ;;  %v3139_v17 = vadd.f32 1e-20, %v3115_v42  ;;  %v3145_v48 = vpop.xlane.xlu0 %562  ;;  %v816_v15 = vmul.f32 %v2118_v11, %v3084_v8  ;;  %v843_v10 = vmul.f32 %v2120_v27, %v3088_v53 }
 0x145   : > { %v1223_v24 = vmul.f32 %v1159_v19, %v2928_v33  ;;  %v2122_v33 = vpop.eup %2121  ;;  %v817_v19 = vmul.f32 %v2116_v9, %v3072_v25  ;;  %3385 = vst [vmem:[#allocation16_spill] sm:$0xff] %v3145_v48  ;;  %v942_v4 = vmul.f32 %v2112_v44, %v878_v43  ;;  %v3155_v42 = vadd.f32 1e-20, %v3145_v48 }
 0x146   : > { %v1003_v12 = vmul.f32 %v939_v59, %v3055_v38  ;;  %v2124_v38 = vpop.eup %2123  ;;  %v846_v39 = vmul.f32 %v2122_v33, %v3094_v29  ;;  %v1037_v18 = vmul.f32 %v973_v61, %v3032_v23  ;;  %v1036_v52 = vmul.f32 %v972_v56, %v3043_v40 }
 0x147   : > { %v1553_v37 = vrot.slane %v1223_v24, %v2471_v58  ;;  %v2126_v60 = vpop.eup %2125  ;;  %v907_v24 = vsub.f32 2.0, %v843_v10  ;;  %v1132_v44 = vmul.f32 %v1068_v1, %v940_v7  ;;  %v1226_v43 = vmul.f32 %v1162_v51, %v2918_v16 }
 0x148   : > { %v1067_v3 = vsub.f32 2.0, %v1003_v12  ;;  %v881_v12 = vsub.f32 2.0, %v817_v19  ;;  %v880_v63 = vsub.f32 2.0, %v816_v15  ;;  %v910_v62 = vsub.f32 2.0, %v846_v39 }
 0x149   : > { %v1554_v28 = vsel %vm1325_vm5, %v1553_v37, %v3038_v35  ;;  %v971_v48 = vmul.f32 %v2120_v27, %v907_v24  ;;  %v848_v40 = vmul.f32 %v2126_v60, %v3109_v14  ;;  %v1101_v1 = vsub.f32 2.0, %v1037_v18 }
 0x14a   : > { %v1131_v22 = vmul.f32 %v1067_v3, %v939_v59  ;;  %v849_v3 = vmul.f32 %v2124_v38, %v3101_v13  ;;  %v1006_v59 = vmul.f32 %v942_v4, %v3050_v26  ;;  %v1100_v16 = vsub.f32 2.0, %v1036_v52  ;;  %v3386_v52 = vld [vmem:[#allocation13_spill] sm:$0xff] }
 0x14b   : > { %v945_v51 = vmul.f32 %v2116_v9, %v881_v12  ;;  %v912_v19 = vsub.f32 2.0, %v848_v40  ;;  %v1629_v35 = vsel %vm1618_vm9, %v1554_v28, %v3078_v0  ;;  %v1567_v26 = vrot.slane %v1226_v43, %v2465_v50 }
 0x14c   : > { %v1195_v49 = vmul.f32 %v1131_v22, %v2993_v41  ;;  %v1035_v41 = vmul.f32 %v971_v48, %v3088_v53  ;;  %v913_v7 = vsub.f32 2.0, %v849_v3  ;;  %2131 = vrcp.f32 %v3139_v17 }
 0x14d   : > { %v944_v27 = vmul.f32 %v2118_v11, %v880_v63  ;;  %v974_v37 = vmul.f32 %v2122_v33, %v910_v62  ;;  %2133 = vrcp.f32 %v3143_v21  ;;  %v1165_v53 = vmul.f32 %v1101_v1, %v973_v61 }
 0x14e   : > { %v1420_v23 = vrot.slane %v1195_v49, %v2471_v58  ;;  %v1070_v49 = vsub.f32 2.0, %v1006_v59  ;;  %v1099_v39 = vsub.f32 2.0, %v1035_v41  ;;  %v1164_v15 = vmul.f32 %v1100_v16, %v972_v56 }
 0x14f   : > { %2135 = vrcp.f32 %v3148_v45  ;;  %v1009_v22 = vmul.f32 %v945_v51, %v3072_v25  ;;  %v977_v0 = vmul.f32 %v2124_v38, %v913_v7  ;;  %v976_v18 = vmul.f32 %v2126_v60, %v912_v19 }
 0x150   : > { %v1421_v9 = vsel %vm1325_vm5, %v1420_v23, %v1416_v5  ;;  %v1163_v10 = vmul.f32 %v1099_v39, %v971_v48  ;;  %2137 = vrcp.f32 %v3155_v42  ;;  %v3180_v12 = vmul.f32 %v1133_v34, %v3386_v52 }
 0x151   : > { %v1134_v11 = vmul.f32 %v1070_v49, %v942_v4  ;;  %v3185_v5 = vsel %vm1620_vm10, %v1421_v9, %v3091_v32  ;;  %v3188_v33 = vmul.f32 %v1132_v44, %v2902_v55  ;;  %v1008_v61 = vmul.f32 %v944_v27, %v3084_v8 }
 0x152   : > { %v1227_v62 = vmul.f32 %v1163_v10, %v3052_v46  ;;  %v1038_v25 = vmul.f32 %v974_v37, %v3094_v29  ;;  %v3193_v56 = vmul.f32 %v1165_v53, %v2940_v36  ;;  %v3196_v48 = vmul.f32 %v1164_v15, %v2955_v57  ;;  %v2128_v46 = vpop.eup %2127 }
 0x153   : > { %v1568_v32 = vsel %vm1318_vm4, %v1567_v26, %v3058_v20  ;;  %v1073_v4 = vsub.f32 2.0, %v1009_v22  ;;  %v1041_v55 = vmul.f32 %v977_v0, %v3101_v13  ;;  %v1040_v34 = vmul.f32 %v976_v18, %v3109_v14  ;;  %v2130_v60 = vpop.eup %2129 }
 0x154   : > { %v1572_v38 = vrot.slane %v1227_v62, %v2471_v58  ;;  %v1429_v8 = vrot.slane %v3180_v12, %v2484_v6  ;;  %v3206_v36 = vmul.f32 %v1134_v11, %v2982_v47  ;;  %v818_v57 = vmul.f32 %v2128_v46, %v3128_v2  ;;  %v3396_v12 = vld [vmem:[#allocation16_spill] sm:$0xff] }
 0x155   : > { %v1425_v24 = vrot.slane %v3188_v33, %v2467_v54  ;;  %v1072_v20 = vsub.f32 2.0, %v1008_v61  ;;  %v1102_v44 = vsub.f32 2.0, %v1038_v25  ;;  %v1581_v43 = vrot.slane %v3193_v56, %v2484_v6 }
 0x156   : > { %v1573_v29 = vsel %vm1325_vm5, %v1572_v38, %v1568_v32  ;;  %v2132_v14 = vpop.eup %2131  ;;  %v1577_v47 = vrot.slane %v3196_v48, %v2467_v54  ;;  %v882_v3 = vsub.f32 2.0, %v818_v57  ;;  %v815_v28 = vmul.f32 %v2130_v60, %v3131_v30 }
 0x157   : > { %v3213_v13 = vsel %vm1620_vm10, %v1573_v29, %v1629_v35  ;;  %v2134_v59 = vpop.eup %2133  ;;  %v1137_v63 = vmul.f32 %v1073_v4, %v945_v51  ;;  %v1105_v23 = vsub.f32 2.0, %v1041_v55  ;;  %v1104_v40 = vsub.f32 2.0, %v1040_v34 }
 0x158   : > { %v850_v1 = vmul.f32 %v2132_v14, %v3139_v17  ;;  %v1434_v41 = vrot.slane %v3206_v36, %v2465_v50  ;;  %v946_v7 = vmul.f32 %v2128_v46, %v882_v3  ;;  %v879_v19 = vsub.f32 2.0, %v815_v28 }
 0x159   : > { %v2136_v16 = vpop.eup %2135  ;;  %v847_v35 = vmul.f32 %v2134_v59, %v3143_v21  ;;  %v1136_v49 = vmul.f32 %v1072_v20, %v944_v27  ;;  %v1166_v39 = vmul.f32 %v1102_v44, %v974_v37  ;;  %v1169_v52 = vmul.f32 %v1105_v23, %v977_v0  ;;  %v3387_v37 = vld [vmem:[#allocation8_spill] sm:$0xff] }
 0x15a   : > { %v2138_v26 = vpop.eup %2137  ;;  %v914_v9 = vsub.f32 2.0, %v850_v1  ;;  %v851_v53 = vmul.f32 %v2136_v16, %v3148_v45  ;;  %v1010_v51 = vmul.f32 %v946_v7, %v3128_v2  ;;  %v943_v15 = vmul.f32 %v2130_v60, %v879_v19  ;;  %v3389_v20 = vld [vmem:[#allocation4_spill] sm:$0xff] }
 0x15b   : > { %v911_v10 = vsub.f32 2.0, %v847_v35  ;;  %v819_v22 = vmul.f32 %v2138_v26, %v3155_v42  ;;  %v1168_v11 = vmul.f32 %v1104_v40, %v976_v18  ;;  %v1201_v27 = vmul.f32 %v1137_v63, %v3011_v31  ;;  %v3388_v18 = vld [vmem:[#allocation7_spill] sm:$0xff]  ;;  %v3390_v31 = vld [vmem:[#allocation6_spill] sm:$0xff]  ;;  %v3391_v23 = vld [vmem:[#allocation12_spill] sm:$0xff] }
 0x15c   : > { %v978_v62 = vmul.f32 %v2132_v14, %v914_v9  ;;  %v915_v61 = vsub.f32 2.0, %v851_v53  ;;  %v1074_v25 = vsub.f32 2.0, %v1010_v51  ;;  %v1007_v38 = vmul.f32 %v943_v15, %v3131_v30 }
 0x15d   : > { %v975_v46 = vmul.f32 %v2134_v59, %v911_v10  ;;  %v883_v32 = vsub.f32 2.0, %v819_v22  ;;  %v1230_v4 = vmul.f32 %v1166_v39, %v3387_v37  ;;  %v1233_v60 = vmul.f32 %v1169_v52, %v3388_v18  ;;  %v3393_v39 = vld [vmem:[#allocation11_spill] sm:$0xff] }
 0x15e   : > { %v1042_v55 = vmul.f32 %v978_v62, %v3139_v17  ;;  %v979_v2 = vmul.f32 %v2136_v16, %v915_v61  ;;  %v1138_v34 = vmul.f32 %v1074_v25, %v946_v7  ;;  %v1071_v57 = vsub.f32 2.0, %v1007_v38  ;;  %v3392_v7 = vld [vmem:[#allocation10_spill] sm:$0xff]  ;;  %v3395_v61 = vld [vmem:[#allocation15_spill] sm:$0xff] }
 0x15f   : > { %v1039_v29 = vmul.f32 %v975_v46, %v3143_v21  ;;  %v947_v0 = vmul.f32 %v2138_v26, %v883_v32  ;;  %v1232_v44 = vmul.f32 %v1168_v11, %v3389_v20  ;;  %v1200_v3 = vmul.f32 %v1136_v49, %v3390_v31 }
 0x160   : > { %v1106_v14 = vsub.f32 2.0, %v1042_v55  ;;  %v1043_v30 = vmul.f32 %v979_v2, %v3148_v45  ;;  %v1135_v28 = vmul.f32 %v1071_v57, %v943_v15  ;;  %v1448_v63 = vrot.slane %v1201_v27, %v2484_v6  ;;  %v3394_v15 = vld [vmem:[#allocation14_spill] sm:$0xff] }
 0x161   : > { %v1103_v59 = vsub.f32 2.0, %v1039_v29  ;;  %v1011_v17 = vmul.f32 %v947_v0, %v3155_v42  ;;  %v1202_v21 = vmul.f32 %v1138_v34, %v3391_v23  ;;  %v1586_v16 = vrot.slane %v1230_v4, %v2465_v50  ;;  %v3397_v4 = vld [vmem:[#allocation2_spill] sm:$0xff]  ;;  %v3398_v34 = vld [vmem:[#allocation9_spill] sm:$0xff] }
 0x162   : > { %v1170_v40 = vmul.f32 %v1106_v14, %v978_v62  ;;  %v1107_v1 = vsub.f32 2.0, %v1043_v30  ;;  %v1199_v19 = vmul.f32 %v1135_v28, %v3392_v7  ;;  %v1600_v26 = vrot.slane %v1233_v60, %v2484_v6 }
 0x163   : > { %v1167_v35 = vmul.f32 %v1103_v59, %v975_v46  ;;  %v1075_v45 = vsub.f32 2.0, %v1011_v17  ;;  %v1596_v49 = vrot.slane %v1232_v44, %v2467_v54  ;;  %v1444_v42 = vrot.slane %v1200_v3, %v2467_v54 }
 0x164   : > { %v1234_v9 = vmul.f32 %v1170_v40, %v3393_v39  ;;  %v1171_v53 = vmul.f32 %v1107_v1, %v979_v2  ;;  %v1439_v51 = vrot.slane %v1199_v19, %v2471_v58  ;;  %v1430_v52 = vsel %vm1311_vm3, %v1429_v8, %v1425_v24 }
 0x165   : > { %v1231_v10 = vmul.f32 %v1167_v35, %v3394_v15  ;;  %v1139_v22 = vmul.f32 %v1075_v45, %v947_v0  ;;  %v1453_v11 = vrot.slane %v1202_v21, %v2465_v50  ;;  %v1582_v33 = vsel %vm1311_vm3, %v1581_v43, %v1577_v47  ;;  %v3400_v0 = vld [vmem:[#allocation5_spill] sm:$0xff] }
 0x166   : > { %v1605_v62 = vrot.slane %v1234_v9, %v2465_v50  ;;  %v1235_v25 = vmul.f32 %v1171_v53, %v3395_v61  ;;  %v1435_v8 = vsel %vm1318_vm4, %v1434_v41, %v1430_v52  ;;  %v1587_v32 = vsel %vm1318_vm4, %v1586_v16, %v1582_v33 }
 0x167   : > { %v1591_v38 = vrot.slane %v1231_v10, %v2471_v58  ;;  %v1203_v46 = vmul.f32 %v1139_v22, %v3396_v12  ;;  %v1601_v54 = vsel %vm1311_vm3, %v1600_v26, %v1596_v49  ;;  %v1440_v48 = vsel %vm1325_vm5, %v1439_v51, %v1435_v8 }
 0x168   : > { %v1610_v24 = vrot.slane %v1235_v25, %v2471_v58  ;;  %v1606_v43 = vsel %vm1318_vm4, %v1605_v62, %v1601_v54  ;;  %v1449_v47 = vsel %vm1311_vm3, %v1448_v63, %v1444_v42 }
 0x169   : > { %v1458_v6 = vrot.slane %v1203_v46, %v2471_v58  ;;  %v1592_v56 = vsel %vm1325_vm5, %v1591_v38, %v1587_v32  ;;  %v1454_v41 = vsel %vm1318_vm4, %v1453_v11, %v1449_v47  ;;  %v1623_v58 = vsel %vm1622_vm11, %v1440_v48, %v3185_v5 }
 0x16a   : > { %v1611_v50 = vsel %vm1325_vm5, %v1610_v24, %v1606_v43  ;;  %v1631_v36 = vsel %vm1622_vm11, %v1592_v56, %v3213_v13  ;;  %v3399_v13 = vld [vmem:[#allocation3_spill] sm:$0xff] }
 0x16b   : > { %v1632_v27 = vsel %vm1624_vm12, %v1611_v50, %v1631_v36  ;;  %v1459_v37 = vsel %vm1325_vm5, %v1458_v6, %v1454_v41 }
 0x16c   : > { %v1636_v55 = vmul.f32 %v3397_v4, %v1632_v27  ;;  %v1625_v2 = vsel %vm1624_vm12, %v1459_v37, %v1623_v58 }
 0x16d   : > { %v1635_v57 = vmul.f32 %v1625_v2, %v3398_v34 }
 0x16e   : > { %v1715_v29 = vadd.f32 %v3399_v13, %v1636_v55 }
 0x16f   : > { %v1710_v18 = vadd.f32 %v3400_v0, %v1635_v57 }
 0x170   : > { %1719 = vst.msk [vmem:[%s302_s27 + $0x8] sm:$0xff] %vm467_vm0, %v1715_v29 }
 0x171   : > { %1718 = vst.msk [vmem:[%s302_s27] sm:$0xff] %vm467_vm0, %v1710_v18 }
 0x172 PF: > { %s14_s19 = sadd.s32 1, %s2177_s19   ;;  %s3401_s15 = smov %s2169_s17 }
 0x173   : > { %p11_p8 = scmp.ge.s32.totalorder %s14_s19, 10   ;;  %s3402_s16 = smov %s2173_s18 }
 0x174   : > { %s3403_s17 = smov %s3406_s20  ;;  %s3404_s18 = smov %s3410_s21 }
 0x175   :  { %13 = sbr.rel (!%p11_p8) target bundleno = 3 (0x3), region = 75 }

</bundles_post_ra>
